<compile_context>
chip_gen: v5e
topology: v5e:2x2
jax: 0.10.0
libtpu: 0.0.40
codegen_flags: <defaults>
</compile_context>

<pallas_src>
import numpy as np
import jax
import jax.numpy as jnp
from jax.experimental import pallas as pl
from jax.experimental.pallas import tpu as pltpu


def bilstm_kernel(ids_ref, lens_ref, tab_ref, whh_ref, wc_ref, out_ref):
    SB = ids_ref.shape[0]              # S*B token rows, time-major (row = t*B + b)
    Vp = tab_ref.shape[0]              # padded vocab
    B, F = out_ref.shape
    H = whh_ref.shape[0] // 2
    S = SB // B
    G = 4 * H
    B2 = 2 * B

    # ---- (1) fused embedding lookup + input projection (both dirs, biases folded) ----
    ids = ids_ref[...]                                              # (S*B, 1) int32
    iota_v = jax.lax.broadcasted_iota(jnp.int32, (SB, Vp), 1)
    onehot = (iota_v == ids).astype(jnp.float32)                    # (S*B, Vp)
    xp = jnp.dot(onehot, tab_ref[...],
                 preferred_element_type=jnp.float32)                # (S*B, 8H), in regs

    # ---- hoisted loop invariants ----
    whh = whh_ref[...]                                              # (2H, 4H) stacked
    lens_bh = jnp.broadcast_to(lens_ref[...], (B, H))               # (B, H) int32
    lens2 = jnp.concatenate([lens_bh, lens_bh], axis=0)             # (2B, H)
    t_max = jnp.maximum(jnp.max(lens_ref[...]), 1)                  # >=1 guards len==0
    fwd_rows = jax.lax.broadcasted_iota(jnp.int32, (B2, H), 0) < B  # (2B, H) bool
    zeros2 = jnp.zeros((B2, H), jnp.float32)
    ninf2 = jnp.full((B2, H), -jnp.inf, jnp.float32)

    h, c, m = zeros2, zeros2, ninf2

    # ---- (2) fused bidirectional recurrence: S steps, one MXU push per step ----
    for s in range(S):                 # static unroll -> static slices of xp
        tb = S - 1 - s
        x = jnp.concatenate(
            [xp[s * B:(s + 1) * B, 0:G],          # forward gates at t = s
             xp[tb * B:(tb + 1) * B, G:2 * G]],   # backward gates at t = S-1-s
            axis=0)                                               # (2B, 4H)
        # blocked LHS: fwd rows carry h in cols [0:H], bwd rows in cols [H:2H]
        h_blk = jnp.concatenate([jnp.where(fwd_rows, h, 0.0),
                                 jnp.where(fwd_rows, 0.0, h)], axis=1)     # (2B, 2H)
        z = x + jnp.dot(h_blk, whh, preferred_element_type=jnp.float32)    # (2B, 4H)

        i = jax.nn.sigmoid(z[:, 0:H])
        f = jax.nn.sigmoid(z[:, H:2 * H])
        g = jnp.tanh(z[:, 2 * H:3 * H])
        o = jax.nn.sigmoid(z[:, 3 * H:4 * H])
        c_new = f * c + i * g
        h_new = o * jnp.tanh(c_new)

        # pack_padded_sequence: state does not advance past this row's length.
        t_vec = jnp.where(fwd_rows, s, tb)                          # (2B, H) int32
        valid = t_vec < lens2
        m = jnp.maximum(m, jnp.where(valid, h_new, ninf2))
        h = jnp.where(valid, h_new, h)
        c = jnp.where(valid, c_new, c)

    # pad_packed_sequence zero-fills [len_b, t_max): those zeros join the max.
    m = jnp.where(lens2 < t_max, jnp.maximum(m, 0.0), m)

    # 1x1 conv (no bias): single (2B, H) @ (H, 2F) matmul, then combine dir halves.
    ostk = jnp.dot(m, wc_ref[...], preferred_element_type=jnp.float32)     # (2B, 2F)
    out_ref[...] = ostk[0:B, 0:F] + ostk[B:B2, F:2 * F]


def pack_params(params):
    """One-time parameter packing (hoisted off the per-call hot path)."""
    H = params["whh_f"].shape[1]
    F = params["wc"].shape[0]
    V = params["embed"].shape[0]

    # combined input projection (E, 8H) = [forward 4H | backward 4H], gate order (i,f,g,o)
    wih_comb = jnp.concatenate([params["wih_f"].T, params["wih_b"].T], axis=1)
    b_comb = jnp.concatenate([params["bih_f"] + params["bhh_f"],
                              params["bih_b"] + params["bhh_b"]]).reshape(1, 8 * H)
    # fuse embedding with the input projection: row v = embed[v] @ wih + b
    tab = params["embed"].astype(jnp.float32) @ wih_comb + b_comb            # (V, 8H)
    v_pad = ((V + 7) // 8) * 8
    tab = jnp.pad(tab, ((0, v_pad - V), (0, 0)))                             # (Vp, 8H)

    # vertically stacked recurrent weights: rows 0:H forward, H:2H backward
    whh_stack = jnp.concatenate([params["whh_f"].T, params["whh_b"].T], axis=0)  # (2H, 4H)

    # 1x1 conv weight rearranged so a single (2B,H)@(H,2F) matmul serves both dirs
    wc2d = params["wc"].reshape(F, 2 * H)
    wc_cat = jnp.concatenate([wc2d[:, 0:H].T, wc2d[:, H:2 * H].T], axis=1)       # (H, 2F)

    return dict(tab=jnp.asarray(tab, jnp.float32),
                whh=jnp.asarray(whh_stack, jnp.float32),
                wc=jnp.asarray(wc_cat, jnp.float32))


@jax.jit
def bilstm_forward(text, text_length, packed):
    """text: (B, S) int32 token ids, text_length: (B,) int32, packed: pack_params(...)."""
    B, S = text.shape
    F = packed["wc"].shape[1] // 2

    # time-major flattened token ids (row = t*B + b); tiny (S*B,1) int32 reshape only
    ids_tm = jnp.transpose(text).reshape(S * B, 1).astype(jnp.int32)
    lens = text_length.astype(jnp.int32).reshape(B, 1)

    vmem = pl.BlockSpec(memory_space=pltpu.MemorySpace.VMEM)
    return pl.pallas_call(
        bilstm_kernel,
        out_shape=jax.ShapeDtypeStruct((B, F), jnp.float32),
        in_specs=[vmem] * 5,
        out_specs=vmem,
    )(ids_tm, lens, packed["tab"], packed["whh"], packed["wc"])


def _numpy_reference(text, lengths, p):
    """Independent NumPy replica of the PyTorch forward semantics."""
    def sig(x):
        return 1.0 / (1.0 + np.exp(-x))

    text = np.asarray(text)
    lengths = np.asarray(lengths)
    B, S = text.shape
    H = p["whh_f"].shape[1]
    emb = np.asarray(p["embed"])[text]               # (B, S, E)
    t_max = int(lengths.max())
    out = np.zeros((B, t_max, 2 * H), np.float32)

    def cell(x, h, c, wih, whh, bih, bhh):
        z = x @ np.asarray(wih).T + h @ np.asarray(whh).T + np.asarray(bih) + np.asarray(bhh)
        i, f, g, o = sig(z[:H]), sig(z[H:2*H]), np.tanh(z[2*H:3*H]), sig(z[3*H:])
        c = f * c + i * g
        return o * np.tanh(c), c

    for b in range(B):
        L = int(lengths[b])
        h = np.zeros(H, np.float32); c = np.zeros(H, np.float32)
        for t in range(L):
            h, c = cell(emb[b, t], h, c, p["wih_f"], p["whh_f"], p["bih_f"], p["bhh_f"])
            out[b, t, :H] = h
        h = np.zeros(H, np.float32); c = np.zeros(H, np.float32)
        for t in range(L - 1, -1, -1):
            h, c = cell(emb[b, t], h, c, p["wih_b"], p["whh_b"], p["bih_b"], p["bhh_b"])
            out[b, t, H:] = h

    bilstm_out = out.max(axis=1)                     # (B, 2H)
    wc2d = np.asarray(p["wc"]).reshape(p["wc"].shape[0], 2 * H)
    return bilstm_out @ wc2d.T                       # (B, F)


if __name__ == "__main__":
    # config-implied sizes (small): vocab V=50, text_embedding D=32,
    # hidden_dim_size H=32, feature_size F=16, bidirectional=True
    V, D, H, F = 50, 32, 32, 16
    B, S = 2, 8

    key = jax.random.PRNGKey(0)
    ks = jax.random.split(key, 12)

    def u(k, shape):
        return jax.random.uniform(k, shape, jnp.float32, -0.1, 0.1)

    embed = u(ks[0], (V, D))
    embed = embed.at[0].set(0.0)                     # padding_idx=0

    params = dict(
        embed=embed,
        wih_f=u(ks[1], (4 * H, D)), whh_f=u(ks[2], (4 * H, H)),
        bih_f=u(ks[3], (4 * H,)),   bhh_f=u(ks[4], (4 * H,)),
        wih_b=u(ks[5], (4 * H, D)), whh_b=u(ks[6], (4 * H, H)),
        bih_b=u(ks[7], (4 * H,)),   bhh_b=u(ks[8], (4 * H,)),
        wc=u(ks[9], (F, 2 * H, 1, 1)),               # Conv2d weight, bias=False
    )

    text = jax.random.randint(ks[10], (B, S), 1, V).astype(jnp.int32)
    text_length = jnp.array([S, 5], dtype=jnp.int32)
    # zero out the padded token ids (as a real padded batch would have)
    pad_mask = jnp.arange(S)[None, :] < text_length[:, None]
    text = jnp.where(pad_mask, text, 0)

    packed = pack_params(params)                     # one-time parameter packing
    out = bilstm_forward(text, text_length, packed)
    out = jax.block_until_ready(out)

    ref = _numpy_reference(np.asarray(text), np.asarray(text_length), params)
    np.testing.assert_allclose(np.asarray(out), ref, atol=1e-4, rtol=1e-4)

    print("KERNEL_OK")
</pallas_src>

<mosaic_0001>
module attributes {stable_mosaic.version = 11 : i64} {
  func.func @bilstm_kernel(%arg0: memref<16x1xi32, #tpu.memory_space<vmem>>, %arg1: memref<2x1xi32, #tpu.memory_space<vmem>>, %arg2: memref<56x256xf32, #tpu.memory_space<vmem>>, %arg3: memref<64x128xf32, #tpu.memory_space<vmem>>, %arg4: memref<32x32xf32, #tpu.memory_space<vmem>>, %arg5: memref<2x16xf32, #tpu.memory_space<vmem>>) attributes {dimension_semantics = [], scalar_prefetch = 0 : i64, scratch_operands = 0 : i64, tpu.core_type = #tpu.core_type<tc>} {
    %c0 = arith.constant 0 : index
    %c0_0 = arith.constant 0 : index
    %0 = vector.load %arg0[%c0, %c0_0] : memref<16x1xi32, #tpu.memory_space<vmem>>, vector<16x1xi32>
    %1 = tpu.iota {dimensions = array<i32: 1>} : vector<16x56xi32>
    %2 = vector.broadcast %0 : vector<16x1xi32> to vector<16x56xi32>
    %3 = arith.cmpi eq, %1, %2 : vector<16x56xi32>
    %4 = arith.extui %3 : vector<16x56xi1> to vector<16x56xi32>
    %5 = arith.sitofp %4 : vector<16x56xi32> to vector<16x56xf32>
    %c0_1 = arith.constant 0 : index
    %c0_2 = arith.constant 0 : index
    %6 = vector.load %arg2[%c0_1, %c0_2] : memref<56x256xf32, #tpu.memory_space<vmem>>, vector<56x256xf32>
    %cst = arith.constant dense<0.000000e+00> : vector<16x256xf32>
    %7 = tpu.matmul %5, %6, %cst {dimension_numbers = #tpu.dot_dimension_numbers<[1], [0], [0], [1], [0, 0, 1, 1], [], []>} : vector<16x56xf32>, vector<56x256xf32>, vector<16x256xf32> -> vector<16x256xf32>
    %c0_3 = arith.constant 0 : index
    %c0_4 = arith.constant 0 : index
    %8 = vector.load %arg3[%c0_3, %c0_4] : memref<64x128xf32, #tpu.memory_space<vmem>>, vector<64x128xf32>
    %c0_5 = arith.constant 0 : index
    %c0_6 = arith.constant 0 : index
    %9 = vector.load %arg1[%c0_5, %c0_6] : memref<2x1xi32, #tpu.memory_space<vmem>>, vector<2x1xi32>
    %10 = vector.shape_cast %9 : vector<2x1xi32> to vector<2x1xi32>
    %11 = vector.broadcast %10 : vector<2x1xi32> to vector<2x32xi32>
    %12 = tpu.concatenate %11, %11 in 0 : vector<2x32xi32>, vector<2x32xi32> -> vector<4x32xi32>
    %c0_7 = arith.constant 0 : index
    %c0_8 = arith.constant 0 : index
    %13 = vector.load %arg1[%c0_7, %c0_8] : memref<2x1xi32, #tpu.memory_space<vmem>>, vector<2x1xi32>
    %14 = vector.shape_cast %13 : vector<2x1xi32> to vector<1x2x1xi32>
    %cst_9 = arith.constant dense<-2147483648> : vector<1xi32>
    %15 = vector.multi_reduction <maxsi>, %14, %cst_9 [1, 2] : vector<1x2x1xi32> to vector<1xi32>
    %16 = vector.shape_cast %15 : vector<1xi32> to vector<1x1x1xi32>
    %17 = vector.extract %16[0, 0, 0] : i32 from vector<1x1x1xi32>
    %c1_i32 = arith.constant 1 : i32
    %18 = arith.maxsi %17, %c1_i32 : i32
    %19 = tpu.iota {dimensions = array<i32: 0>} : vector<4x32xi32>
    %c2_i32 = arith.constant 2 : i32
    %20 = vector.broadcast %c2_i32 : i32 to vector<4x32xi32>
    %21 = arith.cmpi slt, %19, %20 : vector<4x32xi32>
    %cst_10 = arith.constant 0.000000e+00 : f32
    %22 = vector.broadcast %cst_10 : f32 to vector<4x32xf32>
    %cst_11 = arith.constant 0xFF800000 : f32
    %23 = vector.broadcast %cst_11 : f32 to vector<4x32xf32>
    %24 = vector.extract_strided_slice %7 {offsets = [0, 0], sizes = [2, 128], strides = [1, 1]} : vector<16x256xf32> to vector<2x128xf32>
    %25 = vector.extract_strided_slice %7 {offsets = [14, 128], sizes = [2, 128], strides = [1, 1]} : vector<16x256xf32> to vector<2x128xf32>
    %26 = tpu.concatenate %24, %25 in 0 : vector<2x128xf32>, vector<2x128xf32> -> vector<4x128xf32>
    %cst_12 = arith.constant 0.000000e+00 : f32
    %27 = vector.broadcast %cst_12 : f32 to vector<4x32xf32>
    %28 = arith.select %21, %22, %27 : vector<4x32xi1>, vector<4x32xf32>
    %cst_13 = arith.constant 0.000000e+00 : f32
    %29 = vector.broadcast %cst_13 : f32 to vector<4x32xf32>
    %30 = arith.select %21, %29, %22 : vector<4x32xi1>, vector<4x32xf32>
    %31 = tpu.concatenate %28, %30 in 1 : vector<4x32xf32>, vector<4x32xf32> -> vector<4x64xf32>
    %cst_14 = arith.constant dense<0.000000e+00> : vector<4x128xf32>
    %32 = tpu.matmul %31, %8, %cst_14 {dimension_numbers = #tpu.dot_dimension_numbers<[1], [0], [0], [1], [0, 0, 1, 1], [], []>} : vector<4x64xf32>, vector<64x128xf32>, vector<4x128xf32> -> vector<4x128xf32>
    %33 = arith.addf %26, %32 : vector<4x128xf32>
    %34 = vector.extract_strided_slice %33 {offsets = [0, 0], sizes = [4, 32], strides = [1, 1]} : vector<4x128xf32> to vector<4x32xf32>
    %35 = arith.negf %34 : vector<4x32xf32>
    %36 = math.exp %35 : vector<4x32xf32>
    %cst_15 = arith.constant 1.000000e+00 : f32
    %37 = vector.broadcast %cst_15 : f32 to vector<4x32xf32>
    %38 = arith.addf %37, %36 : vector<4x32xf32>
    %39 = arith.divf %37, %38 : vector<4x32xf32>
    %40 = vector.extract_strided_slice %33 {offsets = [0, 32], sizes = [4, 32], strides = [1, 1]} : vector<4x128xf32> to vector<4x32xf32>
    %41 = arith.negf %40 : vector<4x32xf32>
    %42 = math.exp %41 : vector<4x32xf32>
    %cst_16 = arith.constant 1.000000e+00 : f32
    %43 = vector.broadcast %cst_16 : f32 to vector<4x32xf32>
    %44 = arith.addf %43, %42 : vector<4x32xf32>
    %45 = arith.divf %43, %44 : vector<4x32xf32>
    %46 = vector.extract_strided_slice %33 {offsets = [0, 64], sizes = [4, 32], strides = [1, 1]} : vector<4x128xf32> to vector<4x32xf32>
    %47 = math.tanh %46 : vector<4x32xf32>
    %48 = vector.extract_strided_slice %33 {offsets = [0, 96], sizes = [4, 32], strides = [1, 1]} : vector<4x128xf32> to vector<4x32xf32>
    %49 = arith.negf %48 : vector<4x32xf32>
    %50 = math.exp %49 : vector<4x32xf32>
    %cst_17 = arith.constant 1.000000e+00 : f32
    %51 = vector.broadcast %cst_17 : f32 to vector<4x32xf32>
    %52 = arith.addf %51, %50 : vector<4x32xf32>
    %53 = arith.divf %51, %52 : vector<4x32xf32>
    %54 = arith.mulf %45, %22 : vector<4x32xf32>
    %55 = arith.mulf %39, %47 : vector<4x32xf32>
    %56 = arith.addf %54, %55 : vector<4x32xf32>
    %57 = math.tanh %56 : vector<4x32xf32>
    %58 = arith.mulf %53, %57 : vector<4x32xf32>
    %c0_i32 = arith.constant 0 : i32
    %c7_i32 = arith.constant 7 : i32
    %59 = vector.broadcast %c0_i32 : i32 to vector<4x32xi32>
    %60 = vector.broadcast %c7_i32 : i32 to vector<4x32xi32>
    %61 = arith.select %21, %59, %60 : vector<4x32xi1>, vector<4x32xi32>
    %62 = arith.cmpi slt, %61, %12 : vector<4x32xi32>
    %63 = arith.select %62, %58, %23 : vector<4x32xi1>, vector<4x32xf32>
    %64 = arith.maximumf %23, %63 : vector<4x32xf32>
    %65 = arith.select %62, %58, %22 : vector<4x32xi1>, vector<4x32xf32>
    %66 = arith.select %62, %56, %22 : vector<4x32xi1>, vector<4x32xf32>
    %67 = vector.extract_strided_slice %7 {offsets = [2, 0], sizes = [2, 128], strides = [1, 1]} : vector<16x256xf32> to vector<2x128xf32>
    %68 = vector.extract_strided_slice %7 {offsets = [12, 128], sizes = [2, 128], strides = [1, 1]} : vector<16x256xf32> to vector<2x128xf32>
    %69 = tpu.concatenate %67, %68 in 0 : vector<2x128xf32>, vector<2x128xf32> -> vector<4x128xf32>
    %cst_18 = arith.constant 0.000000e+00 : f32
    %70 = vector.broadcast %cst_18 : f32 to vector<4x32xf32>
    %71 = arith.select %21, %65, %70 : vector<4x32xi1>, vector<4x32xf32>
    %cst_19 = arith.constant 0.000000e+00 : f32
    %72 = vector.broadcast %cst_19 : f32 to vector<4x32xf32>
    %73 = arith.select %21, %72, %65 : vector<4x32xi1>, vector<4x32xf32>
    %74 = tpu.concatenate %71, %73 in 1 : vector<4x32xf32>, vector<4x32xf32> -> vector<4x64xf32>
    %cst_20 = arith.constant dense<0.000000e+00> : vector<4x128xf32>
    %75 = tpu.matmul %74, %8, %cst_20 {dimension_numbers = #tpu.dot_dimension_numbers<[1], [0], [0], [1], [0, 0, 1, 1], [], []>} : vector<4x64xf32>, vector<64x128xf32>, vector<4x128xf32> -> vector<4x128xf32>
    %76 = arith.addf %69, %75 : vector<4x128xf32>
    %77 = vector.extract_strided_slice %76 {offsets = [0, 0], sizes = [4, 32], strides = [1, 1]} : vector<4x128xf32> to vector<4x32xf32>
    %78 = arith.negf %77 : vector<4x32xf32>
    %79 = math.exp %78 : vector<4x32xf32>
    %cst_21 = arith.constant 1.000000e+00 : f32
    %80 = vector.broadcast %cst_21 : f32 to vector<4x32xf32>
    %81 = arith.addf %80, %79 : vector<4x32xf32>
    %82 = arith.divf %80, %81 : vector<4x32xf32>
    %83 = vector.extract_strided_slice %76 {offsets = [0, 32], sizes = [4, 32], strides = [1, 1]} : vector<4x128xf32> to vector<4x32xf32>
    %84 = arith.negf %83 : vector<4x32xf32>
    %85 = math.exp %84 : vector<4x32xf32>
    %cst_22 = arith.constant 1.000000e+00 : f32
    %86 = vector.broadcast %cst_22 : f32 to vector<4x32xf32>
    %87 = arith.addf %86, %85 : vector<4x32xf32>
    %88 = arith.divf %86, %87 : vector<4x32xf32>
    %89 = vector.extract_strided_slice %76 {offsets = [0, 64], sizes = [4, 32], strides = [1, 1]} : vector<4x128xf32> to vector<4x32xf32>
    %90 = math.tanh %89 : vector<4x32xf32>
    %91 = vector.extract_strided_slice %76 {offsets = [0, 96], sizes = [4, 32], strides = [1, 1]} : vector<4x128xf32> to vector<4x32xf32>
    %92 = arith.negf %91 : vector<4x32xf32>
    %93 = math.exp %92 : vector<4x32xf32>
    %cst_23 = arith.constant 1.000000e+00 : f32
    %94 = vector.broadcast %cst_23 : f32 to vector<4x32xf32>
    %95 = arith.addf %94, %93 : vector<4x32xf32>
    %96 = arith.divf %94, %95 : vector<4x32xf32>
    %97 = arith.mulf %88, %66 : vector<4x32xf32>
    %98 = arith.mulf %82, %90 : vector<4x32xf32>
    %99 = arith.addf %97, %98 : vector<4x32xf32>
    %100 = math.tanh %99 : vector<4x32xf32>
    %101 = arith.mulf %96, %100 : vector<4x32xf32>
    %c1_i32_24 = arith.constant 1 : i32
    %c6_i32 = arith.constant 6 : i32
    %102 = vector.broadcast %c1_i32_24 : i32 to vector<4x32xi32>
    %103 = vector.broadcast %c6_i32 : i32 to vector<4x32xi32>
    %104 = arith.select %21, %102, %103 : vector<4x32xi1>, vector<4x32xi32>
    %105 = arith.cmpi slt, %104, %12 : vector<4x32xi32>
    %106 = arith.select %105, %101, %23 : vector<4x32xi1>, vector<4x32xf32>
    %107 = arith.maximumf %64, %106 : vector<4x32xf32>
    %108 = arith.select %105, %101, %65 : vector<4x32xi1>, vector<4x32xf32>
    %109 = arith.select %105, %99, %66 : vector<4x32xi1>, vector<4x32xf32>
    %110 = vector.extract_strided_slice %7 {offsets = [4, 0], sizes = [2, 128], strides = [1, 1]} : vector<16x256xf32> to vector<2x128xf32>
    %111 = vector.extract_strided_slice %7 {offsets = [10, 128], sizes = [2, 128], strides = [1, 1]} : vector<16x256xf32> to vector<2x128xf32>
    %112 = tpu.concatenate %110, %111 in 0 : vector<2x128xf32>, vector<2x128xf32> -> vector<4x128xf32>
    %cst_25 = arith.constant 0.000000e+00 : f32
    %113 = vector.broadcast %cst_25 : f32 to vector<4x32xf32>
    %114 = arith.select %21, %108, %113 : vector<4x32xi1>, vector<4x32xf32>
    %cst_26 = arith.constant 0.000000e+00 : f32
    %115 = vector.broadcast %cst_26 : f32 to vector<4x32xf32>
    %116 = arith.select %21, %115, %108 : vector<4x32xi1>, vector<4x32xf32>
    %117 = tpu.concatenate %114, %116 in 1 : vector<4x32xf32>, vector<4x32xf32> -> vector<4x64xf32>
    %cst_27 = arith.constant dense<0.000000e+00> : vector<4x128xf32>
    %118 = tpu.matmul %117, %8, %cst_27 {dimension_numbers = #tpu.dot_dimension_numbers<[1], [0], [0], [1], [0, 0, 1, 1], [], []>} : vector<4x64xf32>, vector<64x128xf32>, vector<4x128xf32> -> vector<4x128xf32>
    %119 = arith.addf %112, %118 : vector<4x128xf32>
    %120 = vector.extract_strided_slice %119 {offsets = [0, 0], sizes = [4, 32], strides = [1, 1]} : vector<4x128xf32> to vector<4x32xf32>
    %121 = arith.negf %120 : vector<4x32xf32>
    %122 = math.exp %121 : vector<4x32xf32>
    %cst_28 = arith.constant 1.000000e+00 : f32
    %123 = vector.broadcast %cst_28 : f32 to vector<4x32xf32>
    %124 = arith.addf %123, %122 : vector<4x32xf32>
    %125 = arith.divf %123, %124 : vector<4x32xf32>
    %126 = vector.extract_strided_slice %119 {offsets = [0, 32], sizes = [4, 32], strides = [1, 1]} : vector<4x128xf32> to vector<4x32xf32>
    %127 = arith.negf %126 : vector<4x32xf32>
    %128 = math.exp %127 : vector<4x32xf32>
    %cst_29 = arith.constant 1.000000e+00 : f32
    %129 = vector.broadcast %cst_29 : f32 to vector<4x32xf32>
    %130 = arith.addf %129, %128 : vector<4x32xf32>
    %131 = arith.divf %129, %130 : vector<4x32xf32>
    %132 = vector.extract_strided_slice %119 {offsets = [0, 64], sizes = [4, 32], strides = [1, 1]} : vector<4x128xf32> to vector<4x32xf32>
    %133 = math.tanh %132 : vector<4x32xf32>
    %134 = vector.extract_strided_slice %119 {offsets = [0, 96], sizes = [4, 32], strides = [1, 1]} : vector<4x128xf32> to vector<4x32xf32>
    %135 = arith.negf %134 : vector<4x32xf32>
    %136 = math.exp %135 : vector<4x32xf32>
    %cst_30 = arith.constant 1.000000e+00 : f32
    %137 = vector.broadcast %cst_30 : f32 to vector<4x32xf32>
    %138 = arith.addf %137, %136 : vector<4x32xf32>
    %139 = arith.divf %137, %138 : vector<4x32xf32>
    %140 = arith.mulf %131, %109 : vector<4x32xf32>
    %141 = arith.mulf %125, %133 : vector<4x32xf32>
    %142 = arith.addf %140, %141 : vector<4x32xf32>
    %143 = math.tanh %142 : vector<4x32xf32>
    %144 = arith.mulf %139, %143 : vector<4x32xf32>
    %c2_i32_31 = arith.constant 2 : i32
    %c5_i32 = arith.constant 5 : i32
    %145 = vector.broadcast %c2_i32_31 : i32 to vector<4x32xi32>
    %146 = vector.broadcast %c5_i32 : i32 to vector<4x32xi32>
    %147 = arith.select %21, %145, %146 : vector<4x32xi1>, vector<4x32xi32>
    %148 = arith.cmpi slt, %147, %12 : vector<4x32xi32>
    %149 = arith.select %148, %144, %23 : vector<4x32xi1>, vector<4x32xf32>
    %150 = arith.maximumf %107, %149 : vector<4x32xf32>
    %151 = arith.select %148, %144, %108 : vector<4x32xi1>, vector<4x32xf32>
    %152 = arith.select %148, %142, %109 : vector<4x32xi1>, vector<4x32xf32>
    %153 = vector.extract_strided_slice %7 {offsets = [6, 0], sizes = [2, 128], strides = [1, 1]} : vector<16x256xf32> to vector<2x128xf32>
    %154 = vector.extract_strided_slice %7 {offsets = [8, 128], sizes = [2, 128], strides = [1, 1]} : vector<16x256xf32> to vector<2x128xf32>
    %155 = tpu.concatenate %153, %154 in 0 : vector<2x128xf32>, vector<2x128xf32> -> vector<4x128xf32>
    %cst_32 = arith.constant 0.000000e+00 : f32
    %156 = vector.broadcast %cst_32 : f32 to vector<4x32xf32>
    %157 = arith.select %21, %151, %156 : vector<4x32xi1>, vector<4x32xf32>
    %cst_33 = arith.constant 0.000000e+00 : f32
    %158 = vector.broadcast %cst_33 : f32 to vector<4x32xf32>
    %159 = arith.select %21, %158, %151 : vector<4x32xi1>, vector<4x32xf32>
    %160 = tpu.concatenate %157, %159 in 1 : vector<4x32xf32>, vector<4x32xf32> -> vector<4x64xf32>
    %cst_34 = arith.constant dense<0.000000e+00> : vector<4x128xf32>
    %161 = tpu.matmul %160, %8, %cst_34 {dimension_numbers = #tpu.dot_dimension_numbers<[1], [0], [0], [1], [0, 0, 1, 1], [], []>} : vector<4x64xf32>, vector<64x128xf32>, vector<4x128xf32> -> vector<4x128xf32>
    %162 = arith.addf %155, %161 : vector<4x128xf32>
    %163 = vector.extract_strided_slice %162 {offsets = [0, 0], sizes = [4, 32], strides = [1, 1]} : vector<4x128xf32> to vector<4x32xf32>
    %164 = arith.negf %163 : vector<4x32xf32>
    %165 = math.exp %164 : vector<4x32xf32>
    %cst_35 = arith.constant 1.000000e+00 : f32
    %166 = vector.broadcast %cst_35 : f32 to vector<4x32xf32>
    %167 = arith.addf %166, %165 : vector<4x32xf32>
    %168 = arith.divf %166, %167 : vector<4x32xf32>
    %169 = vector.extract_strided_slice %162 {offsets = [0, 32], sizes = [4, 32], strides = [1, 1]} : vector<4x128xf32> to vector<4x32xf32>
    %170 = arith.negf %169 : vector<4x32xf32>
    %171 = math.exp %170 : vector<4x32xf32>
    %cst_36 = arith.constant 1.000000e+00 : f32
    %172 = vector.broadcast %cst_36 : f32 to vector<4x32xf32>
    %173 = arith.addf %172, %171 : vector<4x32xf32>
    %174 = arith.divf %172, %173 : vector<4x32xf32>
    %175 = vector.extract_strided_slice %162 {offsets = [0, 64], sizes = [4, 32], strides = [1, 1]} : vector<4x128xf32> to vector<4x32xf32>
    %176 = math.tanh %175 : vector<4x32xf32>
    %177 = vector.extract_strided_slice %162 {offsets = [0, 96], sizes = [4, 32], strides = [1, 1]} : vector<4x128xf32> to vector<4x32xf32>
    %178 = arith.negf %177 : vector<4x32xf32>
    %179 = math.exp %178 : vector<4x32xf32>
    %cst_37 = arith.constant 1.000000e+00 : f32
    %180 = vector.broadcast %cst_37 : f32 to vector<4x32xf32>
    %181 = arith.addf %180, %179 : vector<4x32xf32>
    %182 = arith.divf %180, %181 : vector<4x32xf32>
    %183 = arith.mulf %174, %152 : vector<4x32xf32>
    %184 = arith.mulf %168, %176 : vector<4x32xf32>
    %185 = arith.addf %183, %184 : vector<4x32xf32>
    %186 = math.tanh %185 : vector<4x32xf32>
    %187 = arith.mulf %182, %186 : vector<4x32xf32>
    %c3_i32 = arith.constant 3 : i32
    %c4_i32 = arith.constant 4 : i32
    %188 = vector.broadcast %c3_i32 : i32 to vector<4x32xi32>
    %189 = vector.broadcast %c4_i32 : i32 to vector<4x32xi32>
    %190 = arith.select %21, %188, %189 : vector<4x32xi1>, vector<4x32xi32>
    %191 = arith.cmpi slt, %190, %12 : vector<4x32xi32>
    %192 = arith.select %191, %187, %23 : vector<4x32xi1>, vector<4x32xf32>
    %193 = arith.maximumf %150, %192 : vector<4x32xf32>
    %194 = arith.select %191, %187, %151 : vector<4x32xi1>, vector<4x32xf32>
    %195 = arith.select %191, %185, %152 : vector<4x32xi1>, vector<4x32xf32>
    %196 = vector.extract_strided_slice %7 {offsets = [8, 0], sizes = [2, 128], strides = [1, 1]} : vector<16x256xf32> to vector<2x128xf32>
    %197 = vector.extract_strided_slice %7 {offsets = [6, 128], sizes = [2, 128], strides = [1, 1]} : vector<16x256xf32> to vector<2x128xf32>
    %198 = tpu.concatenate %196, %197 in 0 : vector<2x128xf32>, vector<2x128xf32> -> vector<4x128xf32>
    %cst_38 = arith.constant 0.000000e+00 : f32
    %199 = vector.broadcast %cst_38 : f32 to vector<4x32xf32>
    %200 = arith.select %21, %194, %199 : vector<4x32xi1>, vector<4x32xf32>
    %cst_39 = arith.constant 0.000000e+00 : f32
    %201 = vector.broadcast %cst_39 : f32 to vector<4x32xf32>
    %202 = arith.select %21, %201, %194 : vector<4x32xi1>, vector<4x32xf32>
    %203 = tpu.concatenate %200, %202 in 1 : vector<4x32xf32>, vector<4x32xf32> -> vector<4x64xf32>
    %cst_40 = arith.constant dense<0.000000e+00> : vector<4x128xf32>
    %204 = tpu.matmul %203, %8, %cst_40 {dimension_numbers = #tpu.dot_dimension_numbers<[1], [0], [0], [1], [0, 0, 1, 1], [], []>} : vector<4x64xf32>, vector<64x128xf32>, vector<4x128xf32> -> vector<4x128xf32>
    %205 = arith.addf %198, %204 : vector<4x128xf32>
    %206 = vector.extract_strided_slice %205 {offsets = [0, 0], sizes = [4, 32], strides = [1, 1]} : vector<4x128xf32> to vector<4x32xf32>
    %207 = arith.negf %206 : vector<4x32xf32>
    %208 = math.exp %207 : vector<4x32xf32>
    %cst_41 = arith.constant 1.000000e+00 : f32
    %209 = vector.broadcast %cst_41 : f32 to vector<4x32xf32>
    %210 = arith.addf %209, %208 : vector<4x32xf32>
    %211 = arith.divf %209, %210 : vector<4x32xf32>
    %212 = vector.extract_strided_slice %205 {offsets = [0, 32], sizes = [4, 32], strides = [1, 1]} : vector<4x128xf32> to vector<4x32xf32>
    %213 = arith.negf %212 : vector<4x32xf32>
    %214 = math.exp %213 : vector<4x32xf32>
    %cst_42 = arith.constant 1.000000e+00 : f32
    %215 = vector.broadcast %cst_42 : f32 to vector<4x32xf32>
    %216 = arith.addf %215, %214 : vector<4x32xf32>
    %217 = arith.divf %215, %216 : vector<4x32xf32>
    %218 = vector.extract_strided_slice %205 {offsets = [0, 64], sizes = [4, 32], strides = [1, 1]} : vector<4x128xf32> to vector<4x32xf32>
    %219 = math.tanh %218 : vector<4x32xf32>
    %220 = vector.extract_strided_slice %205 {offsets = [0, 96], sizes = [4, 32], strides = [1, 1]} : vector<4x128xf32> to vector<4x32xf32>
    %221 = arith.negf %220 : vector<4x32xf32>
    %222 = math.exp %221 : vector<4x32xf32>
    %cst_43 = arith.constant 1.000000e+00 : f32
    %223 = vector.broadcast %cst_43 : f32 to vector<4x32xf32>
    %224 = arith.addf %223, %222 : vector<4x32xf32>
    %225 = arith.divf %223, %224 : vector<4x32xf32>
    %226 = arith.mulf %217, %195 : vector<4x32xf32>
    %227 = arith.mulf %211, %219 : vector<4x32xf32>
    %228 = arith.addf %226, %227 : vector<4x32xf32>
    %229 = math.tanh %228 : vector<4x32xf32>
    %230 = arith.mulf %225, %229 : vector<4x32xf32>
    %c4_i32_44 = arith.constant 4 : i32
    %c3_i32_45 = arith.constant 3 : i32
    %231 = vector.broadcast %c4_i32_44 : i32 to vector<4x32xi32>
    %232 = vector.broadcast %c3_i32_45 : i32 to vector<4x32xi32>
    %233 = arith.select %21, %231, %232 : vector<4x32xi1>, vector<4x32xi32>
    %234 = arith.cmpi slt, %233, %12 : vector<4x32xi32>
    %235 = arith.select %234, %230, %23 : vector<4x32xi1>, vector<4x32xf32>
    %236 = arith.maximumf %193, %235 : vector<4x32xf32>
    %237 = arith.select %234, %230, %194 : vector<4x32xi1>, vector<4x32xf32>
    %238 = arith.select %234, %228, %195 : vector<4x32xi1>, vector<4x32xf32>
    %239 = vector.extract_strided_slice %7 {offsets = [10, 0], sizes = [2, 128], strides = [1, 1]} : vector<16x256xf32> to vector<2x128xf32>
    %240 = vector.extract_strided_slice %7 {offsets = [4, 128], sizes = [2, 128], strides = [1, 1]} : vector<16x256xf32> to vector<2x128xf32>
    %241 = tpu.concatenate %239, %240 in 0 : vector<2x128xf32>, vector<2x128xf32> -> vector<4x128xf32>
    %cst_46 = arith.constant 0.000000e+00 : f32
    %242 = vector.broadcast %cst_46 : f32 to vector<4x32xf32>
    %243 = arith.select %21, %237, %242 : vector<4x32xi1>, vector<4x32xf32>
    %cst_47 = arith.constant 0.000000e+00 : f32
    %244 = vector.broadcast %cst_47 : f32 to vector<4x32xf32>
    %245 = arith.select %21, %244, %237 : vector<4x32xi1>, vector<4x32xf32>
    %246 = tpu.concatenate %243, %245 in 1 : vector<4x32xf32>, vector<4x32xf32> -> vector<4x64xf32>
    %cst_48 = arith.constant dense<0.000000e+00> : vector<4x128xf32>
    %247 = tpu.matmul %246, %8, %cst_48 {dimension_numbers = #tpu.dot_dimension_numbers<[1], [0], [0], [1], [0, 0, 1, 1], [], []>} : vector<4x64xf32>, vector<64x128xf32>, vector<4x128xf32> -> vector<4x128xf32>
    %248 = arith.addf %241, %247 : vector<4x128xf32>
    %249 = vector.extract_strided_slice %248 {offsets = [0, 0], sizes = [4, 32], strides = [1, 1]} : vector<4x128xf32> to vector<4x32xf32>
    %250 = arith.negf %249 : vector<4x32xf32>
    %251 = math.exp %250 : vector<4x32xf32>
    %cst_49 = arith.constant 1.000000e+00 : f32
    %252 = vector.broadcast %cst_49 : f32 to vector<4x32xf32>
    %253 = arith.addf %252, %251 : vector<4x32xf32>
    %254 = arith.divf %252, %253 : vector<4x32xf32>
    %255 = vector.extract_strided_slice %248 {offsets = [0, 32], sizes = [4, 32], strides = [1, 1]} : vector<4x128xf32> to vector<4x32xf32>
    %256 = arith.negf %255 : vector<4x32xf32>
    %257 = math.exp %256 : vector<4x32xf32>
    %cst_50 = arith.constant 1.000000e+00 : f32
    %258 = vector.broadcast %cst_50 : f32 to vector<4x32xf32>
    %259 = arith.addf %258, %257 : vector<4x32xf32>
    %260 = arith.divf %258, %259 : vector<4x32xf32>
    %261 = vector.extract_strided_slice %248 {offsets = [0, 64], sizes = [4, 32], strides = [1, 1]} : vector<4x128xf32> to vector<4x32xf32>
    %262 = math.tanh %261 : vector<4x32xf32>
    %263 = vector.extract_strided_slice %248 {offsets = [0, 96], sizes = [4, 32], strides = [1, 1]} : vector<4x128xf32> to vector<4x32xf32>
    %264 = arith.negf %263 : vector<4x32xf32>
    %265 = math.exp %264 : vector<4x32xf32>
    %cst_51 = arith.constant 1.000000e+00 : f32
    %266 = vector.broadcast %cst_51 : f32 to vector<4x32xf32>
    %267 = arith.addf %266, %265 : vector<4x32xf32>
    %268 = arith.divf %266, %267 : vector<4x32xf32>
    %269 = arith.mulf %260, %238 : vector<4x32xf32>
    %270 = arith.mulf %254, %262 : vector<4x32xf32>
    %271 = arith.addf %269, %270 : vector<4x32xf32>
    %272 = math.tanh %271 : vector<4x32xf32>
    %273 = arith.mulf %268, %272 : vector<4x32xf32>
    %c5_i32_52 = arith.constant 5 : i32
    %c2_i32_53 = arith.constant 2 : i32
    %274 = vector.broadcast %c5_i32_52 : i32 to vector<4x32xi32>
    %275 = vector.broadcast %c2_i32_53 : i32 to vector<4x32xi32>
    %276 = arith.select %21, %274, %275 : vector<4x32xi1>, vector<4x32xi32>
    %277 = arith.cmpi slt, %276, %12 : vector<4x32xi32>
    %278 = arith.select %277, %273, %23 : vector<4x32xi1>, vector<4x32xf32>
    %279 = arith.maximumf %236, %278 : vector<4x32xf32>
    %280 = arith.select %277, %273, %237 : vector<4x32xi1>, vector<4x32xf32>
    %281 = arith.select %277, %271, %238 : vector<4x32xi1>, vector<4x32xf32>
    %282 = vector.extract_strided_slice %7 {offsets = [12, 0], sizes = [2, 128], strides = [1, 1]} : vector<16x256xf32> to vector<2x128xf32>
    %283 = vector.extract_strided_slice %7 {offsets = [2, 128], sizes = [2, 128], strides = [1, 1]} : vector<16x256xf32> to vector<2x128xf32>
    %284 = tpu.concatenate %282, %283 in 0 : vector<2x128xf32>, vector<2x128xf32> -> vector<4x128xf32>
    %cst_54 = arith.constant 0.000000e+00 : f32
    %285 = vector.broadcast %cst_54 : f32 to vector<4x32xf32>
    %286 = arith.select %21, %280, %285 : vector<4x32xi1>, vector<4x32xf32>
    %cst_55 = arith.constant 0.000000e+00 : f32
    %287 = vector.broadcast %cst_55 : f32 to vector<4x32xf32>
    %288 = arith.select %21, %287, %280 : vector<4x32xi1>, vector<4x32xf32>
    %289 = tpu.concatenate %286, %288 in 1 : vector<4x32xf32>, vector<4x32xf32> -> vector<4x64xf32>
    %cst_56 = arith.constant dense<0.000000e+00> : vector<4x128xf32>
    %290 = tpu.matmul %289, %8, %cst_56 {dimension_numbers = #tpu.dot_dimension_numbers<[1], [0], [0], [1], [0, 0, 1, 1], [], []>} : vector<4x64xf32>, vector<64x128xf32>, vector<4x128xf32> -> vector<4x128xf32>
    %291 = arith.addf %284, %290 : vector<4x128xf32>
    %292 = vector.extract_strided_slice %291 {offsets = [0, 0], sizes = [4, 32], strides = [1, 1]} : vector<4x128xf32> to vector<4x32xf32>
    %293 = arith.negf %292 : vector<4x32xf32>
    %294 = math.exp %293 : vector<4x32xf32>
    %cst_57 = arith.constant 1.000000e+00 : f32
    %295 = vector.broadcast %cst_57 : f32 to vector<4x32xf32>
    %296 = arith.addf %295, %294 : vector<4x32xf32>
    %297 = arith.divf %295, %296 : vector<4x32xf32>
    %298 = vector.extract_strided_slice %291 {offsets = [0, 32], sizes = [4, 32], strides = [1, 1]} : vector<4x128xf32> to vector<4x32xf32>
    %299 = arith.negf %298 : vector<4x32xf32>
    %300 = math.exp %299 : vector<4x32xf32>
    %cst_58 = arith.constant 1.000000e+00 : f32
    %301 = vector.broadcast %cst_58 : f32 to vector<4x32xf32>
    %302 = arith.addf %301, %300 : vector<4x32xf32>
    %303 = arith.divf %301, %302 : vector<4x32xf32>
    %304 = vector.extract_strided_slice %291 {offsets = [0, 64], sizes = [4, 32], strides = [1, 1]} : vector<4x128xf32> to vector<4x32xf32>
    %305 = math.tanh %304 : vector<4x32xf32>
    %306 = vector.extract_strided_slice %291 {offsets = [0, 96], sizes = [4, 32], strides = [1, 1]} : vector<4x128xf32> to vector<4x32xf32>
    %307 = arith.negf %306 : vector<4x32xf32>
    %308 = math.exp %307 : vector<4x32xf32>
    %cst_59 = arith.constant 1.000000e+00 : f32
    %309 = vector.broadcast %cst_59 : f32 to vector<4x32xf32>
    %310 = arith.addf %309, %308 : vector<4x32xf32>
    %311 = arith.divf %309, %310 : vector<4x32xf32>
    %312 = arith.mulf %303, %281 : vector<4x32xf32>
    %313 = arith.mulf %297, %305 : vector<4x32xf32>
    %314 = arith.addf %312, %313 : vector<4x32xf32>
    %315 = math.tanh %314 : vector<4x32xf32>
    %316 = arith.mulf %311, %315 : vector<4x32xf32>
    %c6_i32_60 = arith.constant 6 : i32
    %c1_i32_61 = arith.constant 1 : i32
    %317 = vector.broadcast %c6_i32_60 : i32 to vector<4x32xi32>
    %318 = vector.broadcast %c1_i32_61 : i32 to vector<4x32xi32>
    %319 = arith.select %21, %317, %318 : vector<4x32xi1>, vector<4x32xi32>
    %320 = arith.cmpi slt, %319, %12 : vector<4x32xi32>
    %321 = arith.select %320, %316, %23 : vector<4x32xi1>, vector<4x32xf32>
    %322 = arith.maximumf %279, %321 : vector<4x32xf32>
    %323 = arith.select %320, %316, %280 : vector<4x32xi1>, vector<4x32xf32>
    %324 = arith.select %320, %314, %281 : vector<4x32xi1>, vector<4x32xf32>
    %325 = vector.extract_strided_slice %7 {offsets = [14, 0], sizes = [2, 128], strides = [1, 1]} : vector<16x256xf32> to vector<2x128xf32>
    %326 = vector.extract_strided_slice %7 {offsets = [0, 128], sizes = [2, 128], strides = [1, 1]} : vector<16x256xf32> to vector<2x128xf32>
    %327 = tpu.concatenate %325, %326 in 0 : vector<2x128xf32>, vector<2x128xf32> -> vector<4x128xf32>
    %cst_62 = arith.constant 0.000000e+00 : f32
    %328 = vector.broadcast %cst_62 : f32 to vector<4x32xf32>
    %329 = arith.select %21, %323, %328 : vector<4x32xi1>, vector<4x32xf32>
    %cst_63 = arith.constant 0.000000e+00 : f32
    %330 = vector.broadcast %cst_63 : f32 to vector<4x32xf32>
    %331 = arith.select %21, %330, %323 : vector<4x32xi1>, vector<4x32xf32>
    %332 = tpu.concatenate %329, %331 in 1 : vector<4x32xf32>, vector<4x32xf32> -> vector<4x64xf32>
    %cst_64 = arith.constant dense<0.000000e+00> : vector<4x128xf32>
    %333 = tpu.matmul %332, %8, %cst_64 {dimension_numbers = #tpu.dot_dimension_numbers<[1], [0], [0], [1], [0, 0, 1, 1], [], []>} : vector<4x64xf32>, vector<64x128xf32>, vector<4x128xf32> -> vector<4x128xf32>
    %334 = arith.addf %327, %333 : vector<4x128xf32>
    %335 = vector.extract_strided_slice %334 {offsets = [0, 0], sizes = [4, 32], strides = [1, 1]} : vector<4x128xf32> to vector<4x32xf32>
    %336 = arith.negf %335 : vector<4x32xf32>
    %337 = math.exp %336 : vector<4x32xf32>
    %cst_65 = arith.constant 1.000000e+00 : f32
    %338 = vector.broadcast %cst_65 : f32 to vector<4x32xf32>
    %339 = arith.addf %338, %337 : vector<4x32xf32>
    %340 = arith.divf %338, %339 : vector<4x32xf32>
    %341 = vector.extract_strided_slice %334 {offsets = [0, 32], sizes = [4, 32], strides = [1, 1]} : vector<4x128xf32> to vector<4x32xf32>
    %342 = arith.negf %341 : vector<4x32xf32>
    %343 = math.exp %342 : vector<4x32xf32>
    %cst_66 = arith.constant 1.000000e+00 : f32
    %344 = vector.broadcast %cst_66 : f32 to vector<4x32xf32>
    %345 = arith.addf %344, %343 : vector<4x32xf32>
    %346 = arith.divf %344, %345 : vector<4x32xf32>
    %347 = vector.extract_strided_slice %334 {offsets = [0, 64], sizes = [4, 32], strides = [1, 1]} : vector<4x128xf32> to vector<4x32xf32>
    %348 = math.tanh %347 : vector<4x32xf32>
    %349 = vector.extract_strided_slice %334 {offsets = [0, 96], sizes = [4, 32], strides = [1, 1]} : vector<4x128xf32> to vector<4x32xf32>
    %350 = arith.negf %349 : vector<4x32xf32>
    %351 = math.exp %350 : vector<4x32xf32>
    %cst_67 = arith.constant 1.000000e+00 : f32
    %352 = vector.broadcast %cst_67 : f32 to vector<4x32xf32>
    %353 = arith.addf %352, %351 : vector<4x32xf32>
    %354 = arith.divf %352, %353 : vector<4x32xf32>
    %355 = arith.mulf %346, %324 : vector<4x32xf32>
    %356 = arith.mulf %340, %348 : vector<4x32xf32>
    %357 = arith.addf %355, %356 : vector<4x32xf32>
    %358 = math.tanh %357 : vector<4x32xf32>
    %359 = arith.mulf %354, %358 : vector<4x32xf32>
    %c7_i32_68 = arith.constant 7 : i32
    %c0_i32_69 = arith.constant 0 : i32
    %360 = vector.broadcast %c7_i32_68 : i32 to vector<4x32xi32>
    %361 = vector.broadcast %c0_i32_69 : i32 to vector<4x32xi32>
    %362 = arith.select %21, %360, %361 : vector<4x32xi1>, vector<4x32xi32>
    %363 = arith.cmpi slt, %362, %12 : vector<4x32xi32>
    %364 = arith.select %363, %359, %23 : vector<4x32xi1>, vector<4x32xf32>
    %365 = arith.maximumf %322, %364 : vector<4x32xf32>
    %366 = vector.broadcast %18 : i32 to vector<4x32xi32>
    %367 = arith.cmpi slt, %12, %366 : vector<4x32xi32>
    %cst_70 = arith.constant 0.000000e+00 : f32
    %368 = vector.broadcast %cst_70 : f32 to vector<4x32xf32>
    %369 = arith.maximumf %365, %368 : vector<4x32xf32>
    %370 = arith.select %367, %369, %365 : vector<4x32xi1>, vector<4x32xf32>
    %c0_71 = arith.constant 0 : index
    %c0_72 = arith.constant 0 : index
    %371 = vector.load %arg4[%c0_71, %c0_72] : memref<32x32xf32, #tpu.memory_space<vmem>>, vector<32x32xf32>
    %cst_73 = arith.constant dense<0.000000e+00> : vector<4x32xf32>
    %372 = tpu.matmul %370, %371, %cst_73 {dimension_numbers = #tpu.dot_dimension_numbers<[1], [0], [0], [1], [0, 0, 1, 1], [], []>} : vector<4x32xf32>, vector<32x32xf32>, vector<4x32xf32> -> vector<4x32xf32>
    %373 = vector.extract_strided_slice %372 {offsets = [0, 0], sizes = [2, 16], strides = [1, 1]} : vector<4x32xf32> to vector<2x16xf32>
    %374 = vector.extract_strided_slice %372 {offsets = [2, 16], sizes = [2, 16], strides = [1, 1]} : vector<4x32xf32> to vector<2x16xf32>
    %375 = arith.addf %373, %374 : vector<2x16xf32>
    %c0_74 = arith.constant 0 : index
    %c0_75 = arith.constant 0 : index
    %376 = vector.load %arg5[%c0_74, %c0_75] : memref<2x16xf32, #tpu.memory_space<vmem>>, vector<2x16xf32>
    tpu.vector_store %arg5[%c0_74, %c0_75], %375 {strides = array<i32>} : memref<2x16xf32, #tpu.memory_space<vmem>>, vector<2x16xf32>,
    return
  }
}

</mosaic_0001>

<bundles_post_ra>
// kernel: bilstm_forward.1
= control target key start
LH: loop header
LB: loop body
LE: loop exit
PB: predicated region body
PF: predicated region fallthrough
CT: control target
= control target key end

     0   :  { %10 = vsyncpa [#allocation3], 0  ;;  %s1579_s0 = inlined_call_operand.vmem [shape: s32[16,1], index: 0, kind: input, shape index: {}]   ;;  %s1580_s1 = inlined_call_operand.vmem [shape: s32[2,1], index: 1, kind: input, shape index: {}]   ;;  %s1581_s2 = inlined_call_operand.hbm [shape: f32[56,256], index: 2, kind: input, shape index: {}]   ;;  %s1582_s3 = inlined_call_operand.hbm [shape: f32[64,128], index: 3, kind: input, shape index: {}]   ;;  %s1583_s4 = inlined_call_operand.vmem [shape: f32[32,32], index: 4, kind: input, shape index: {}]   ;;  %s1584_s5 = inlined_call_operand.hbm [shape: f32[2,16], index: 5, kind: output, shape index: {}]  }
   0x1   :  { %11 = vsyncpa [#allocation6], 0 }
   0x2   :  { %12 = vsyncpa [#allocation4], 0  ;;  %s21_s20 = sshll.u32 %s1581_s2, 4  ;;  %s1135_s21 = smov [#allocation2]   ;;  %s22_s20 = int_to_ptr.hbm [resolvable:$true] %s21_s20 }
   0x3   :  { %s23_s22 = sshll.u32 %s1135_s21, 4  ;;  %s34_s25 = sshll.u32 %s1582_s3, 4  ;;  %s24_s22 = int_to_ptr.vmem [resolvable:$true] %s23_s22  ;;  %s35_s25 = int_to_ptr.hbm [resolvable:$true] %s34_s25 }
   0x4   :  { %s1136_s26 = smov 256   ;;  %s1137_s27 = smov 16  }
   0x5   :  { %29 = dma.hbm_to_vmem [thread:$0]  %s22_s20, 1792, %s24_s22, [#allocation3], %s1136_s26, %s1136_s26, %s1137_s27  }
   0x6   :  { %s1138_s28 = smov [#allocation5]   ;;  %s1139_s30 = smov 128  }
   0x7   :  { %s36_s29 = sshll.u32 %s1138_s28, 4  ;;  %s1140_s6 = smov 8   ;;  %s37_s29 = int_to_ptr.vmem [resolvable:$true] %s36_s29 }
   0x8   :  { %42 = dma.hbm_to_vmem [thread:$0]  %s35_s25, 1024, %s37_s29, [#allocation6], %s1139_s30, %s1139_s30, %s1140_s6  }
   0x9   :  { %1129 = dma.done.wait [#allocation3], 1792  }
   0xa   :  { %1130 = vsyncadd [#allocation3], 4294965504 }
   0xb   :  { %1131 = dma.done.wait [#allocation6], 1024  }
   0xc   :  { %1132 = vsyncadd [#allocation6], 4294966272  ;;  %v1141_v0 = vmov 0   ;;  %v53_v1 = vld [vmem:[%s1579_s0] sm:$0xff]  ;;  %v82_v3 = vld [vmem:[#allocation2 + $0x68] sm:$0xff]  ;;  %v1142_v25 = vmov 0.0   ;;  %v55_v26 = vlaneseq }
   0xd   :  { %991 = vset.pattern.permute.xlu0 %v1141_v0  ;;  %992 = vset.pattern.permute.xlu2 %v1141_v0  ;;  %v81_v2 = vld [vmem:[#allocation2 + $0x60] sm:$0xff]  ;;  %v79_v4 = vld [vmem:[#allocation2 + $0x50] sm:$0xff]  ;;  %v80_v5 = vld [vmem:[#allocation2 + $0x58] sm:$0xff]  ;;  %vm83_vm0 = vcmask 457728   ;;  %vm149_vm3 = vcmask 1041408   ;;  %s1144_s9 = smov 32  }
   0xe   :  { %58 = vperm.xlu0 %991, %v53_v1   ;;  %99 = vmatpush.msra.mxu0 %v81_v2  ;;  %v1196_v6 = vld [vmem:[#allocation5 + $0x38] sm:$0xff]  ;;  %v77_v7 = vld [vmem:[#allocation2 + $0x40] sm:$0xff]  ;;  %v75_v10 = vld [vmem:[#allocation2 + $0x30] sm:$0xff]  ;;  %v56_v27 = vand.u32 127, %v55_v26  ;;  %s1145_s12 = smov 96   ;;  %v1305_v62 = vshrl.u32 %v55_v26, 7 }
   0xf   :  { %122 = vmatpush.msra.mxu1 %v82_v3  ;;  %198 = vmatpush.msra.mxu2 %v1196_v6  ;;  %v78_v8 = vld [vmem:[#allocation2 + $0x48] sm:$0xff]  ;;  %v1199_v9 = vld [vmem:[#allocation5 + $0x30] sm:$0xff]  ;;  %v1201_v11 = vld [vmem:[#allocation5 + $0x28] sm:$0xff]  ;;  %v1146_v3 = vmov 7   ;;  %vm273_vm10 = vcmask 261120   ;;  %vm186_vm11 = vcmask 523264  }
  0x10   :  { %100 = vmatpush.msra.mxu0 %v79_v4  ;;  %286 = vmatpush.msra.mxu3 %v1196_v6  ;;  %v76_v12 = vld [vmem:[#allocation2 + $0x38] sm:$0xff]  ;;  %v54_v13 = vld [vmem:[%s1579_s0 + $0x8] sm:$0xff]  ;;  %v73_v14 = vld [vmem:[#allocation2 + $0x20] sm:$0xff]  ;;  %s1143_s0 = smov 64   ;;  %vm181_vm8 = vcmp.lt.s32.totalorder %v1305_v62, 2  ;;  %s1153_s20 = smov 112  }
  0x11   :  { %123 = vmatpush.msra.mxu1 %v80_v5  ;;  %199 = vmatpush.msra.mxu2 %v1199_v9  ;;  %v74_v15 = vld [vmem:[#allocation2 + $0x28] sm:$0xff]  ;;  %v1210_v16 = vld [vmem:[#allocation5 + $0x20] sm:$0xff]  ;;  %v72_v18 = vld [vmem:[#allocation2 + $0x18] sm:$0xff]  ;;  %v1313_v4 = vsel %vm181_vm8, 0, %v1146_v3  ;;  %s1154_s21 = smov [#allocation7]   ;;  %s936_s25 = sshll.u32 %s1584_s5, 4  ;;  %s937_s25 = int_to_ptr.hbm [resolvable:$true] %s936_s25 }
  0x12   :  { %101 = vmatpush.msra.mxu0 %v77_v7  ;;  %287 = vmatpush.msra.mxu3 %v1199_v9  ;;  %v71_v17 = vld [vmem:[#allocation2 + $0x10] sm:$0xff]  ;;  %v1215_v19 = vld [vmem:[#allocation5 + $0x18] sm:$0xff]  ;;  %v69_v20 = vld [vmem:[#allocation2] sm:$0xff]  ;;  %s934_s22 = sshll.u32 %s1154_s21, 4  ;;  %s935_s22 = int_to_ptr.vmem [resolvable:$true] %s934_s22 }
  0x13   :  { %124 = vmatpush.msra.mxu1 %v78_v8  ;;  %200 = vmatpush.msra.mxu2 %v1201_v11  ;;  %v70_v21 = vld [vmem:[#allocation2 + $0x8] sm:$0xff]  ;;  %v1219_v22 = vld [vmem:[#allocation5 + $0x10] sm:$0xff]  ;;  %v1222_v23 = vld [vmem:[#allocation5 + $0x8] sm:$0xff] }
  0x14   :  { %102 = vmatpush.msra.mxu0 %v75_v10  ;;  %288 = vmatpush.msra.mxu3 %v1201_v11  ;;  %v1225_v24 = vld [vmem:[#allocation5] sm:$0xff]  ;;  %v1299_v59 = vld [vmem:[%s1580_s1] sm:$0x3] }
  0x15   :  { %125 = vmatpush.msra.mxu1 %v76_v12  ;;  %201 = vmatpush.msra.mxu2 %v1210_v16 }
  0x16   :  { %61 = vperm.xlu0 %991, %v54_v13   ;;  %103 = vmatpush.msra.mxu0 %v73_v14 }
  0x17   :  { %126 = vmatpush.msra.mxu1 %v74_v15  ;;  %289 = vmatpush.msra.mxu3 %v1210_v16 }
  0x18   :  { %104 = vmatpush.msra.mxu0 %v71_v17  ;;  %202 = vmatpush.msra.mxu2 %v1215_v19 }
  0x19   :  { %127 = vmatpush.msra.mxu1 %v72_v18  ;;  %290 = vmatpush.msra.mxu3 %v1215_v19 }
  0x1a   :  { %105 = vmatpush.msra.mxu0 %v69_v20  ;;  %203 = vmatpush.msra.mxu2 %v1219_v22 }
  0x1b   :  { %128 = vmatpush.msra.mxu1 %v70_v21  ;;  %291 = vmatpush.msra.mxu3 %v1219_v22 }
  0x1c   :  { %375 = vmatpush.msrb.mxu0 %v1196_v6  ;;  %204 = vmatpush.msra.mxu2 %v1222_v23 }
  0x1d   :  { %466 = vmatpush.msrb.mxu1 %v1196_v6  ;;  %292 = vmatpush.msra.mxu3 %v1222_v23 }
  0x1e   :  { %376 = vmatpush.msrb.mxu0 %v1199_v9  ;;  %205 = vmatpush.msra.mxu2 %v1225_v24 }
  0x1f   :  { %467 = vmatpush.msrb.mxu1 %v1199_v9  ;;  %293 = vmatpush.msra.mxu3 %v1225_v24 }
  0x20   :  { %206 = vmatmul.f32.vlgmr.msra.gmra.mxu2 %v1142_v25  ;;  %377 = vmatpush.msrb.mxu0 %v1201_v11 }
  0x21   :  { %468 = vmatpush.msrb.mxu1 %v1201_v11  ;;  %556 = vmatpush.msrb.mxu2 %v1196_v6 }
  0x22   :  { %378 = vmatpush.msrb.mxu0 %v1210_v16  ;;  %648 = vmatpush.msrb.mxu3 %v1196_v6 }
  0x23   :  { %469 = vmatpush.msrb.mxu1 %v1210_v16  ;;  %557 = vmatpush.msrb.mxu2 %v1199_v9 }
  0x24   :  { %379 = vmatpush.msrb.mxu0 %v1215_v19  ;;  %649 = vmatpush.msrb.mxu3 %v1199_v9 }
  0x25   :  { %470 = vmatpush.msrb.mxu1 %v1215_v19  ;;  %558 = vmatpush.msrb.mxu2 %v1201_v11 }
  0x26   :  { %380 = vmatpush.msrb.mxu0 %v1219_v22  ;;  %650 = vmatpush.msrb.mxu3 %v1201_v11 }
  0x27   :  { %471 = vmatpush.msrb.mxu1 %v1219_v22  ;;  %559 = vmatpush.msrb.mxu2 %v1210_v16 }
  0x28   :  { %381 = vmatpush.msrb.mxu0 %v1222_v23  ;;  %651 = vmatpush.msrb.mxu3 %v1210_v16 }
  0x29   :  { %472 = vmatpush.msrb.mxu1 %v1222_v23  ;;  %560 = vmatpush.msrb.mxu2 %v1215_v19 }
  0x2a   :  { %382 = vmatpush.msrb.mxu0 %v1225_v24  ;;  %652 = vmatpush.msrb.mxu3 %v1215_v19 }
  0x2b   :  { %473 = vmatpush.msrb.mxu1 %v1225_v24  ;;  %561 = vmatpush.msrb.mxu2 %v1219_v22 }
  0x2c   :  { %653 = vmatpush.msrb.mxu3 %v1219_v22 }
  0x2d   :  { %562 = vmatpush.msrb.mxu2 %v1222_v23 }
  0x2e   :  { %654 = vmatpush.msrb.mxu3 %v1222_v23 }
  0x2f   :  { %563 = vmatpush.msrb.mxu2 %v1225_v24 }
  0x30   :  { %655 = vmatpush.msrb.mxu3 %v1225_v24 }
  0x80   :  { %v59_v28 = vpop.permute.xlu0 %58 }
  0x81   :  { %vm63_vm1 = vcmp.eq.s32.totalorder %v56_v27, %v59_v28 }
  0x82   :  { %v947_v29 = vsel %vm63_vm1, 1.0, %v1142_v25 }
  0x83   :  { %949 = vmatmul.msk.f32.vlgmr.msra.gmra.mxu0 %vm83_vm0, %v947_v29  ;;  %951 = vmatmul.msk.f32.vlgmr.msra.gmra.mxu1 %vm83_vm0, %v947_v29 }
  0x84   :  { %737 = vmatpush.msra.mxu0 %v1196_v6  ;;  %828 = vmatpush.msra.mxu1 %v1196_v6 }
  0x86   :  { %738 = vmatpush.msra.mxu0 %v1199_v9  ;;  %829 = vmatpush.msra.mxu1 %v1199_v9 }
  0x88   :  { %v62_v30 = vpop.permute.xlu0 %61  ;;  %739 = vmatpush.msra.mxu0 %v1201_v11  ;;  %830 = vmatpush.msra.mxu1 %v1201_v11 }
  0x89   :  { %vm64_vm2 = vcmp.eq.s32.totalorder %v56_v27, %v62_v30 }
  0x8a   :  { %v948_v31 = vsel %vm64_vm2, 1.0, %v1142_v25  ;;  %740 = vmatpush.msra.mxu0 %v1210_v16  ;;  %831 = vmatpush.msra.mxu1 %v1210_v16 }
  0x8b   :  { %950 = vmatmul.msk.f32.gmra.mxu0 %vm83_vm0, %v948_v31  ;;  %952 = vmatmul.msk.f32.gmra.mxu1 %vm83_vm0, %v948_v31 }
  0x8c   :  { %741 = vmatpush.msra.mxu0 %v1215_v19  ;;  %832 = vmatpush.msra.mxu1 %v1215_v19 }
  0x8e   :  { %742 = vmatpush.msra.mxu0 %v1219_v22  ;;  %833 = vmatpush.msra.mxu1 %v1219_v22 }
  0x90   :  { %743 = vmatpush.msra.mxu0 %v1222_v23  ;;  %834 = vmatpush.msra.mxu1 %v1222_v23 }
  0x92   :  { %744 = vmatpush.msra.mxu0 %v1225_v24  ;;  %835 = vmatpush.msra.mxu1 %v1225_v24 }
  0xa3   :  { %v207_v35 = vpop.f32.mrf.mxu2 }
 0x100   :  { %v1284_v32 = vpop.f32.mrf.mxu1  ;;  %v1289_v36 = vpop.f32.mrf.mxu0 }
 0x101   :  { %v262_v14 = vrot.slane %v1289_v36, 2 }
 0x108   :  { %v1286_v33 = vpop.f32.mrf.mxu1 }
 0x109   :  { %v183_v34 = vrot.slane %v1286_v33, 4  ;;  %v264_v13 = vrot.slane %v1286_v33, 2 }
 0x10b   :  { %v185_v37 = vsel %vm149_vm3, %v1289_v36, %v183_v34  ;;  %v266_v15 = vsel %vm149_vm3, %v262_v14, %v264_v13 }
 0x10c   :  { %v210_v38 = vadd.f32 %v207_v35, %v185_v37 }
 0x10e   :  { %993 = vtanh.f32 %v210_v38  ;;  %v953_v40 = vmul.f32 -1.442695, %v210_v38 }
 0x110   :  { %995 = vpow2.f32 %v953_v40 }
 0x114   :  { %v994_v39 = vpop.eup %993 }
 0x115   :  { %233 = vrot.lane.b32.xlu1 %v994_v39, %s1143_s0 }
 0x116   :  { %v996_v41 = vpop.eup %995 }
 0x117   :  { %v214_v42 = vadd.f32 1.0, %v996_v41 }
 0x119   :  { %997 = vrcp.f32 %v214_v42  ;;  %v226_v48 = vand.u32 2147483648, %v214_v42  ;;  %vm220_vm5 = vweird.f32 %v214_v42  ;;  %v224_v49 = vand.u32 2147483647, %v214_v42 }
 0x11b   :  { %v227_v51 = vor.u32 1.1754944e-38, %v226_v48  ;;  %vm225_vm7 = vcmp.eq.f32.partialorder %v224_v49, 8.507059e+37 }
 0x11f   :  { %v998_v43 = vpop.eup %997 }
 0x120   :  { %v216_v44 = vmul.f32 %v998_v43, %v214_v42  ;;  %vm221_vm4 = vweird.f32 %v998_v43 }
 0x121   :  { %vm222_vm6 = vmor %vm220_vm5, %vm221_vm4 }
 0x122   :  { %v217_v45 = vsub.f32 1.0, %v216_v44  ;;  %v1147_v44 = vmov 6  }
 0x124   :  { %v218_v46 = vmul.f32 %v998_v43, %v217_v45  ;;  %v1344_v45 = vsel %vm181_vm8, 1, %v1147_v44 }
 0x126   :  { %v219_v47 = vadd.f32 %v998_v43, %v218_v46 }
 0x128   :  { %v223_v50 = vsel %vm222_vm6, %v998_v43, %v219_v47 }
 0x129   :  { %v228_v53 = vsel %vm225_vm7, %v227_v51, %v223_v50 }
 0x12a   :  { %v231_v55 = vmul.f32 0.0, %v228_v53 }
 0x187   :  { %v234_v52 = vpop.permute.xlu1 %233 }
 0x188   :  { %v236_v54 = vmul.f32 %v234_v52, %v228_v53 }
 0x18a   :  { %238 = vrot.lane.b32.xlu1 %v236_v54, %s1144_s9  ;;  %v1365_v54 = vpop.f32.mrf.mxu0 }
 0x1fc   :  { %v239_v56 = vpop.permute.xlu1 %238 }
 0x1fd   :  { %v241_v57 = vadd.f32 %v239_v56, %v231_v55  ;;  %v354_v55 = vrot.slane %v1289_v36, 4 }
 0x1ff   :  { %999 = vtanh.f32 %v241_v57  ;;  %v356_v56 = vsel %vm149_vm3, %v354_v55, %v1286_v33 }
 0x205   :  { %v1000_v58 = vpop.eup %999 }
 0x206   :  { %244 = vrot.lane.b32.xlu2 %v1000_v58, %s1143_s0 }
 0x20e   :  { %146 = vperm.xlu2 %992, %v1299_v59  }
 0x216   :  { %257 = vrot.lane.b32.xlu2 %v241_v57, %s1145_s12 }
 0x260   :  { %v245_v60 = vpop.permute.xlu2 %244 }
 0x261   :  { %v247_v61 = vmul.f32 %v245_v60, %v228_v53 }
 0x263   :  { %251 = vrot.lane.b32.xlu0 %v247_v61, %s1144_s9 }
 0x268   :  { %v147_v63 = vpop.permute.xlu2 %146 }
 0x269   :  { %v148_v1 = vrot.slane %v147_v63, 6 }
 0x26b   :  { %v1309_v2 = vsel %vm149_vm3, %v147_v63, %v148_v1 }
 0x26c   :  { %vm249_vm9 = vcmp.lt.s32.totalorder %v1313_v4, %v1309_v2  ;;  %vm341_vm0 = vcmp.lt.s32.totalorder %v1344_v45, %v1309_v2 }
 0x270   :  { %v258_v8 = vpop.permute.xlu2 %257 }
 0x271   :  { %v260_v9 = vsel %vm249_vm9, %v258_v8, 0.0 }
 0x2d5   :  { %v1317_v5 = vpop.permute.xlu0 %251 }
 0x2d6   :  { %v255_v6 = vsel %vm249_vm9, %v1317_v5, 0.0 }
 0x2d7   :  { %v268_v7 = vsel %vm181_vm8, 0.0, %v255_v6  ;;  %v267_v11 = vsel %vm181_vm8, %v255_v6, 0.0 }
 0x2d8   :  { %270 = vrot.lane.b32.xlu1 %v268_v7, %s1144_s9 }
 0x2e0   :  { %320 = vrot.lane.b32.xlu1 %v260_v9, %s1144_s9 }
 0x34a   :  { %v271_v10 = vpop.permute.xlu1 %270 }
 0x34b   :  { %v274_v12 = vsel %vm273_vm10, %v267_v11, %v271_v10 }
 0x34c   :  { %954 = vmatmul.msk.f32.vlgmr.msra.gmra.mxu3 %vm186_vm11, %v274_v12 }
 0x352   :  { %v321_v37 = vpop.permute.xlu1 %320 }
 0x3cf   :  { %v295_v16 = vpop.f32.mrf.mxu3 }
 0x3d0   :  { %v298_v17 = vadd.f32 %v295_v16, %v266_v15 }
 0x3d2   :  { %1001 = vtanh.f32 %v298_v17  ;;  %v955_v19 = vmul.f32 -1.442695, %v298_v17 }
 0x3d4   :  { %1003 = vpow2.f32 %v955_v19 }
 0x3d8   :  { %v1002_v18 = vpop.eup %1001 }
 0x3d9   :  { %325 = vrot.lane.b32.xlu0 %v1002_v18, %s1143_s0 }
 0x3da   :  { %v1004_v20 = vpop.eup %1003 }
 0x3db   :  { %v302_v21 = vadd.f32 1.0, %v1004_v20 }
 0x3dd   :  { %1005 = vrcp.f32 %v302_v21  ;;  %v314_v27 = vand.u32 2147483648, %v302_v21  ;;  %vm308_vm13 = vweird.f32 %v302_v21  ;;  %v312_v28 = vand.u32 2147483647, %v302_v21 }
 0x3df   :  { %v315_v30 = vor.u32 1.1754944e-38, %v314_v27  ;;  %vm313_vm15 = vcmp.eq.f32.partialorder %v312_v28, 8.507059e+37 }
 0x3e3   :  { %v1006_v22 = vpop.eup %1005 }
 0x3e4   :  { %v304_v23 = vmul.f32 %v1006_v22, %v302_v21  ;;  %vm309_vm12 = vweird.f32 %v1006_v22 }
 0x3e5   :  { %vm310_vm14 = vmor %vm308_vm13, %vm309_vm12 }
 0x3e6   :  { %v305_v24 = vsub.f32 1.0, %v304_v23 }
 0x3e8   :  { %v306_v25 = vmul.f32 %v1006_v22, %v305_v24  ;;  %v1148_v24 = vmov 5  }
 0x3ea   :  { %v307_v26 = vadd.f32 %v1006_v22, %v306_v25  ;;  %v1377_v25 = vsel %vm181_vm8, 2, %v1148_v24 }
 0x3eb   :  { %vm430_vm6 = vcmp.lt.s32.totalorder %v1377_v25, %v1309_v2 }
 0x3ec   :  { %v311_v29 = vsel %vm310_vm14, %v1006_v22, %v307_v26 }
 0x3ed   :  { %v316_v34 = vsel %vm313_vm15, %v315_v30, %v311_v29 }
 0x3ee   :  { %v323_v38 = vmul.f32 %v321_v37, %v316_v34  ;;  %v445_v37 = vrot.slane %v1286_v33, 6 }
 0x44b   :  { %v326_v31 = vpop.permute.xlu0 %325 }
 0x44c   :  { %v328_v35 = vmul.f32 %v326_v31, %v316_v34 }
 0x44e   :  { %330 = vrot.lane.b32.xlu2 %v328_v35, %s1144_s9 }
 0x4a8   :  { %v331_v39 = vpop.permute.xlu2 %330 }
 0x4a9   :  { %v333_v40 = vadd.f32 %v331_v39, %v323_v38  ;;  %v443_v38 = vrot.slane %v1289_v36, 6 }
 0x4ab   :  { %1007 = vtanh.f32 %v333_v40  ;;  %v447_v39 = vsel %vm149_vm3, %v443_v38, %v445_v37 }
 0x4b1   :  { %v1008_v41 = vpop.eup %1007 }
 0x4b2   :  { %336 = vrot.lane.b32.xlu0 %v1008_v41, %s1143_s0 }
 0x4ba   :  { %350 = vrot.lane.b32.xlu0 %v333_v40, %s1145_s12 }
 0x524   :  { %v337_v42 = vpop.permute.xlu0 %336 }
 0x525   :  { %v339_v43 = vmul.f32 %v337_v42, %v316_v34 }
 0x527   :  { %343 = vrot.lane.b32.xlu1 %v339_v43, %s1144_s9 }
 0x52c   :  { %v351_v49 = vpop.permute.xlu0 %350 }
 0x52d   :  { %v353_v50 = vsel %vm341_vm0, %v351_v49, %v260_v9 }
 0x599   :  { %v1348_v46 = vpop.permute.xlu1 %343 }
 0x59a   :  { %v348_v47 = vsel %vm341_vm0, %v1348_v46, %v255_v6 }
 0x59b   :  { %v358_v48 = vsel %vm181_vm8, 0.0, %v348_v47  ;;  %v357_v52 = vsel %vm181_vm8, %v348_v47, 0.0 }
 0x59c   :  { %360 = vrot.lane.b32.xlu2 %v358_v48, %s1144_s9 }
 0x5a4   :  { %409 = vrot.lane.b32.xlu2 %v353_v50, %s1144_s9 }
 0x5f6   :  { %v361_v51 = vpop.permute.xlu2 %360 }
 0x5f7   :  { %v363_v53 = vsel %vm273_vm10, %v357_v52, %v361_v51 }
 0x5f8   :  { %956 = vmatmul.msk.f32.vlgmr.msrb.gmra.mxu0 %vm186_vm11, %v363_v53 }
 0x5fe   :  { %v410_v17 = vpop.permute.xlu2 %409 }
 0x675   :  { %v384_v57 = vpop.f32.mrf.mxu0 }
 0x676   :  { %v387_v58 = vadd.f32 %v384_v57, %v356_v56 }
 0x678   :  { %1009 = vtanh.f32 %v387_v58  ;;  %v957_v61 = vmul.f32 -1.442695, %v387_v58 }
 0x67a   :  { %1011 = vpow2.f32 %v957_v61 }
 0x67e   :  { %v1010_v60 = vpop.eup %1009 }
 0x67f   :  { %414 = vrot.lane.b32.xlu1 %v1010_v60, %s1143_s0 }
 0x680   :  { %v1012_v63 = vpop.eup %1011 }
 0x681   :  { %v391_v1 = vadd.f32 1.0, %v1012_v63 }
 0x683   :  { %1013 = vrcp.f32 %v391_v1  ;;  %v403_v10 = vand.u32 2147483648, %v391_v1  ;;  %vm397_vm2 = vweird.f32 %v391_v1  ;;  %v401_v11 = vand.u32 2147483647, %v391_v1 }
 0x685   :  { %v404_v13 = vor.u32 1.1754944e-38, %v403_v10  ;;  %vm402_vm5 = vcmp.eq.f32.partialorder %v401_v11, 8.507059e+37 }
 0x689   :  { %v1014_v3 = vpop.eup %1013 }
 0x68a   :  { %v393_v6 = vmul.f32 %v1014_v3, %v391_v1  ;;  %vm398_vm1 = vweird.f32 %v1014_v3 }
 0x68b   :  { %vm399_vm4 = vmor %vm397_vm2, %vm398_vm1 }
 0x68c   :  { %v394_v7 = vsub.f32 1.0, %v393_v6 }
 0x68e   :  { %v395_v8 = vmul.f32 %v1014_v3, %v394_v7 }
 0x690   :  { %v396_v9 = vadd.f32 %v1014_v3, %v395_v8  ;;  %v1149_v8 = vmov 4  }
 0x692   :  { %v400_v12 = vsel %vm399_vm4, %v1014_v3, %v396_v9  ;;  %v1408_v9 = vsel %vm181_vm8, 3, %v1149_v8 }
 0x693   :  { %v405_v15 = vsel %vm402_vm5, %v404_v13, %v400_v12  ;;  %vm521_vm15 = vcmp.lt.s32.totalorder %v1408_v9, %v1309_v2 }
 0x694   :  { %v412_v18 = vmul.f32 %v410_v17, %v405_v15 }
 0x6f1   :  { %v415_v14 = vpop.permute.xlu1 %414 }
 0x6f2   :  { %v417_v16 = vmul.f32 %v415_v14, %v405_v15 }
 0x6f4   :  { %419 = vrot.lane.b32.xlu0 %v417_v16, %s1144_s9 }
 0x766   :  { %v420_v19 = vpop.permute.xlu0 %419 }
 0x767   :  { %v422_v20 = vadd.f32 %v420_v19, %v412_v18  ;;  %v535_v18 = vrot.slane %v1284_v32, 4 }
 0x769   :  { %1015 = vtanh.f32 %v422_v20  ;;  %v537_v19 = vsel %vm149_vm3, %v1365_v54, %v535_v18 }
 0x76f   :  { %v1016_v21 = vpop.eup %1015 }
 0x770   :  { %425 = vrot.lane.b32.xlu1 %v1016_v21, %s1143_s0 }
 0x778   :  { %439 = vrot.lane.b32.xlu1 %v422_v20, %s1145_s12 }
 0x7e2   :  { %v426_v22 = vpop.permute.xlu1 %425 }
 0x7e3   :  { %v428_v23 = vmul.f32 %v426_v22, %v405_v15 }
 0x7e5   :  { %432 = vrot.lane.b32.xlu2 %v428_v23, %s1144_s9 }
 0x7ea   :  { %v440_v29 = vpop.permute.xlu1 %439 }
 0x7eb   :  { %v442_v30 = vsel %vm430_vm6, %v440_v29, %v353_v50 }
 0x83f   :  { %v1381_v26 = vpop.permute.xlu2 %432 }
 0x840   :  { %v437_v27 = vsel %vm430_vm6, %v1381_v26, %v348_v47 }
 0x841   :  { %v449_v28 = vsel %vm181_vm8, 0.0, %v437_v27  ;;  %v448_v34 = vsel %vm181_vm8, %v437_v27, 0.0 }
 0x842   :  { %451 = vrot.lane.b32.xlu0 %v449_v28, %s1144_s9 }
 0x84a   :  { %500 = vrot.lane.b32.xlu0 %v442_v30, %s1144_s9 }
 0x8b4   :  { %v452_v31 = vpop.permute.xlu0 %451 }
 0x8b5   :  { %v454_v35 = vsel %vm273_vm10, %v448_v34, %v452_v31 }
 0x8b6   :  { %958 = vmatmul.msk.f32.vlgmr.msrb.gmra.mxu1 %vm186_vm11, %v454_v35 }
 0x8bc   :  { %v501_v60 = vpop.permute.xlu0 %500 }
 0x933   :  { %v475_v40 = vpop.f32.mrf.mxu1 }
 0x934   :  { %v478_v41 = vadd.f32 %v475_v40, %v447_v39 }
 0x936   :  { %1017 = vtanh.f32 %v478_v41  ;;  %v959_v43 = vmul.f32 -1.442695, %v478_v41 }
 0x938   :  { %1019 = vpow2.f32 %v959_v43 }
 0x93c   :  { %v1018_v42 = vpop.eup %1017 }
 0x93d   :  { %505 = vrot.lane.b32.xlu2 %v1018_v42, %s1143_s0 }
 0x93e   :  { %v1020_v44 = vpop.eup %1019 }
 0x93f   :  { %v482_v47 = vadd.f32 1.0, %v1020_v44 }
 0x941   :  { %1021 = vrcp.f32 %v482_v47  ;;  %v494_v36 = vand.u32 2147483648, %v482_v47  ;;  %vm488_vm12 = vweird.f32 %v482_v47  ;;  %v492_v52 = vand.u32 2147483647, %v482_v47 }
 0x943   :  { %v495_v55 = vor.u32 1.1754944e-38, %v494_v36  ;;  %vm493_vm14 = vcmp.eq.f32.partialorder %v492_v52, 8.507059e+37 }
 0x947   :  { %v1022_v48 = vpop.eup %1021 }
 0x948   :  { %v484_v49 = vmul.f32 %v1022_v48, %v482_v47  ;;  %vm489_vm7 = vweird.f32 %v1022_v48 }
 0x949   :  { %vm490_vm13 = vmor %vm488_vm12, %vm489_vm7 }
 0x94a   :  { %v485_v50 = vsub.f32 1.0, %v484_v49 }
 0x94c   :  { %v486_v51 = vmul.f32 %v1022_v48, %v485_v50 }
 0x94e   :  { %v487_v33 = vadd.f32 %v1022_v48, %v486_v51 }
 0x950   :  { %v491_v53 = vsel %vm490_vm13, %v1022_v48, %v487_v33  ;;  %v1150_v33 = vmov 3  }
 0x951   :  { %v496_v57 = vsel %vm493_vm14, %v495_v55, %v491_v53  ;;  %v1439_v36 = vsel %vm181_vm8, 4, %v1150_v33 }
 0x952   :  { %v503_v61 = vmul.f32 %v501_v60, %v496_v57  ;;  %vm611_vm7 = vcmp.lt.s32.totalorder %v1439_v36, %v1309_v2 }
 0x997   :  { %v506_v56 = vpop.permute.xlu2 %505 }
 0x998   :  { %v508_v58 = vmul.f32 %v506_v56, %v496_v57 }
 0x99a   :  { %510 = vrot.lane.b32.xlu1 %v508_v58, %s1144_s9 }
 0xa0c   :  { %v511_v63 = vpop.permute.xlu1 %510 }
 0xa0d   :  { %v513_v1 = vadd.f32 %v511_v63, %v503_v61  ;;  %v625_v63 = vrot.slane %v1365_v54, 2 }
 0xa0f   :  { %1023 = vtanh.f32 %v513_v1 }
 0xa15   :  { %v1024_v3 = vpop.eup %1023 }
 0xa16   :  { %516 = vrot.lane.b32.xlu2 %v1024_v3, %s1143_s0 }
 0xa1e   :  { %530 = vrot.lane.b32.xlu2 %v513_v1, %s1145_s12  ;;  %v627_v1 = vrot.slane %v1284_v32, 2 }
 0xa20   :  { %v629_v3 = vsel %vm149_vm3, %v625_v63, %v627_v1 }
 0xa70   :  { %v517_v6 = vpop.permute.xlu2 %516 }
 0xa71   :  { %v519_v7 = vmul.f32 %v517_v6, %v496_v57 }
 0xa73   :  { %523 = vrot.lane.b32.xlu0 %v519_v7, %s1144_s9 }
 0xa78   :  { %v531_v13 = vpop.permute.xlu2 %530 }
 0xa79   :  { %v533_v14 = vsel %vm521_vm15, %v531_v13, %v442_v30 }
 0xae5   :  { %v1412_v10 = vpop.permute.xlu0 %523 }
 0xae6   :  { %v528_v11 = vsel %vm521_vm15, %v1412_v10, %v437_v27 }
 0xae7   :  { %v539_v12 = vsel %vm181_vm8, 0.0, %v528_v11  ;;  %v538_v16 = vsel %vm181_vm8, %v528_v11, 0.0 }
 0xae8   :  { %541 = vrot.lane.b32.xlu1 %v539_v12, %s1144_s9 }
 0xaf0   :  { %590 = vrot.lane.b32.xlu1 %v533_v14, %s1144_s9 }
 0xb5a   :  { %v542_v15 = vpop.permute.xlu1 %541 }
 0xb5b   :  { %v544_v17 = vsel %vm273_vm10, %v538_v16, %v542_v15 }
 0xb5c   :  { %960 = vmatmul.msk.f32.vlgmr.msrb.gmra.mxu2 %vm186_vm11, %v544_v17 }
 0xb62   :  { %v591_v43 = vpop.permute.xlu1 %590 }
 0xbdf   :  { %v565_v20 = vpop.f32.mrf.mxu2 }
 0xbe0   :  { %v568_v21 = vadd.f32 %v565_v20, %v537_v19 }
 0xbe2   :  { %1025 = vtanh.f32 %v568_v21  ;;  %v961_v23 = vmul.f32 -1.442695, %v568_v21 }
 0xbe4   :  { %1027 = vpow2.f32 %v961_v23 }
 0xbe8   :  { %v1026_v22 = vpop.eup %1025 }
 0xbe9   :  { %595 = vrot.lane.b32.xlu0 %v1026_v22, %s1143_s0 }
 0xbea   :  { %v1028_v24 = vpop.eup %1027 }
 0xbeb   :  { %v572_v27 = vadd.f32 1.0, %v1028_v24 }
 0xbed   :  { %1029 = vrcp.f32 %v572_v27  ;;  %v584_v35 = vand.u32 2147483648, %v572_v27  ;;  %vm578_vm2 = vweird.f32 %v572_v27  ;;  %v582_v37 = vand.u32 2147483647, %v572_v27 }
 0xbef   :  { %v585_v39 = vor.u32 1.1754944e-38, %v584_v35  ;;  %vm583_vm5 = vcmp.eq.f32.partialorder %v582_v37, 8.507059e+37 }
 0xbf3   :  { %v1030_v28 = vpop.eup %1029 }
 0xbf4   :  { %v574_v29 = vmul.f32 %v1030_v28, %v572_v27  ;;  %vm579_vm1 = vweird.f32 %v1030_v28 }
 0xbf5   :  { %vm580_vm4 = vmor %vm578_vm2, %vm579_vm1 }
 0xbf6   :  { %v575_v30 = vsub.f32 1.0, %v574_v29 }
 0xbf8   :  { %v576_v31 = vmul.f32 %v1030_v28, %v575_v30 }
 0xbfa   :  { %v577_v34 = vadd.f32 %v1030_v28, %v576_v31 }
 0xbfc   :  { %v581_v38 = vsel %vm580_vm4, %v1030_v28, %v577_v34 }
 0xbfd   :  { %v586_v41 = vsel %vm583_vm5, %v585_v39, %v581_v38  ;;  %v1151_v38 = vmov 2  }
 0xbfe   :  { %v593_v44 = vmul.f32 %v591_v43, %v586_v41  ;;  %v1470_v39 = vsel %vm181_vm8, 5, %v1151_v38 }
 0xbff   :  { %vm703_vm2 = vcmp.lt.s32.totalorder %v1470_v39, %v1309_v2 }
 0xc5b   :  { %v596_v40 = vpop.permute.xlu0 %595 }
 0xc5c   :  { %v598_v42 = vmul.f32 %v596_v40, %v586_v41 }
 0xc5e   :  { %600 = vrot.lane.b32.xlu2 %v598_v42, %s1144_s9 }
 0xcb8   :  { %v601_v47 = vpop.permute.xlu2 %600 }
 0xcb9   :  { %v603_v48 = vadd.f32 %v601_v47, %v593_v44 }
 0xcbb   :  { %1031 = vtanh.f32 %v603_v48 }
 0xcc1   :  { %v1032_v49 = vpop.eup %1031 }
 0xcc2   :  { %606 = vrot.lane.b32.xlu0 %v1032_v49, %s1143_s0 }
 0xcca   :  { %620 = vrot.lane.b32.xlu0 %v603_v48, %s1145_s12 }
 0xd34   :  { %v607_v50 = vpop.permute.xlu0 %606 }
 0xd35   :  { %v609_v51 = vmul.f32 %v607_v50, %v586_v41  ;;  %v716_v50 = vrot.slane %v1365_v54, 4 }
 0xd37   :  { %613 = vrot.lane.b32.xlu1 %v609_v51, %s1144_s9  ;;  %v718_v51 = vsel %vm149_vm3, %v716_v50, %v1284_v32 }
 0xd3c   :  { %v621_v56 = vpop.permute.xlu0 %620 }
 0xd3d   :  { %v623_v57 = vsel %vm611_vm7, %v621_v56, %v533_v14 }
 0xda9   :  { %v1443_v52 = vpop.permute.xlu1 %613 }
 0xdaa   :  { %v618_v53 = vsel %vm611_vm7, %v1443_v52, %v528_v11  ;;  %v616_v45 = vsel %vm611_vm7, %v1443_v52, -inf }
 0xdab   :  { %v631_v55 = vsel %vm181_vm8, 0.0, %v618_v53  ;;  %v630_v60 = vsel %vm181_vm8, %v618_v53, 0.0 }
 0xdac   :  { %633 = vrot.lane.b32.xlu2 %v631_v55, %s1144_s9 }
 0xdb4   :  { %682 = vrot.lane.b32.xlu2 %v623_v57, %s1144_s9 }
 0xe06   :  { %v634_v58 = vpop.permute.xlu2 %633 }
 0xe07   :  { %v636_v61 = vsel %vm273_vm10, %v630_v60, %v634_v58 }
 0xe08   :  { %962 = vmatmul.msk.f32.vlgmr.msrb.gmra.mxu3 %vm186_vm11, %v636_v61 }
 0xe0e   :  { %v683_v28 = vpop.permute.xlu2 %682 }
 0xe8b   :  { %v657_v6 = vpop.f32.mrf.mxu3 }
 0xe8c   :  { %v660_v7 = vadd.f32 %v657_v6, %v629_v3 }
 0xe8e   :  { %1033 = vtanh.f32 %v660_v7  ;;  %v963_v11 = vmul.f32 -1.442695, %v660_v7 }
 0xe90   :  { %1035 = vpow2.f32 %v963_v11 }
 0xe94   :  { %v1034_v8 = vpop.eup %1033 }
 0xe95   :  { %687 = vrot.lane.b32.xlu1 %v1034_v8, %s1143_s0 }
 0xe96   :  { %v1036_v12 = vpop.eup %1035 }
 0xe97   :  { %v664_v13 = vadd.f32 1.0, %v1036_v12 }
 0xe99   :  { %1037 = vrcp.f32 %v664_v13  ;;  %v676_v19 = vand.u32 2147483648, %v664_v13  ;;  %vm670_vm13 = vweird.f32 %v664_v13  ;;  %v674_v20 = vand.u32 2147483647, %v664_v13 }
 0xe9b   :  { %v677_v22 = vor.u32 1.1754944e-38, %v676_v19  ;;  %vm675_vm1 = vcmp.eq.f32.partialorder %v674_v20, 8.507059e+37 }
 0xe9f   :  { %v1038_v14 = vpop.eup %1037 }
 0xea0   :  { %v666_v15 = vmul.f32 %v1038_v14, %v664_v13  ;;  %vm671_vm12 = vweird.f32 %v1038_v14 }
 0xea1   :  { %vm672_vm14 = vmor %vm670_vm13, %vm671_vm12 }
 0xea2   :  { %v667_v16 = vsub.f32 1.0, %v666_v15 }
 0xea4   :  { %v668_v17 = vmul.f32 %v1038_v14, %v667_v16 }
 0xea6   :  { %v669_v18 = vadd.f32 %v1038_v14, %v668_v17 }
 0xea8   :  { %v673_v21 = vsel %vm672_vm14, %v1038_v14, %v669_v18 }
 0xea9   :  { %v678_v24 = vsel %vm675_vm1, %v677_v22, %v673_v21  ;;  %v1152_v22 = vmov 1   ;;  %vm151_vm1 = vcmask 1024  }
 0xeaa   :  { %v685_v29 = vmul.f32 %v683_v28, %v678_v24 }
 0xf07   :  { %v688_v23 = vpop.permute.xlu1 %687 }
 0xf08   :  { %v690_v27 = vmul.f32 %v688_v23, %v678_v24  ;;  %v1501_v23 = vsel %vm181_vm8, 6, %v1152_v22 }
 0xf09   :  { %vm792_vm14 = vcmp.lt.s32.totalorder %v1501_v23, %v1309_v2 }
 0xf0a   :  { %692 = vrot.lane.b32.xlu0 %v690_v27, %s1144_s9 }
 0xf7c   :  { %v693_v30 = vpop.permute.xlu0 %692 }
 0xf7d   :  { %v695_v31 = vadd.f32 %v693_v30, %v685_v29 }
 0xf7f   :  { %1039 = vtanh.f32 %v695_v31 }
 0xf85   :  { %v1040_v34 = vpop.eup %1039 }
 0xf86   :  { %698 = vrot.lane.b32.xlu1 %v1040_v34, %s1143_s0 }
 0xf8e   :  { %712 = vrot.lane.b32.xlu1 %v695_v31, %s1145_s12  ;;  %v152_v31 = vsel %vm151_vm1, %v1299_v59, 2147483648  ;;  %v807_v59 = vrot.slane %v1284_v32, 6 }
 0xf8f   :  { %v154_v34 = vshra.s32 %v152_v31, 16 }
 0xff8   :  { %v699_v35 = vpop.permute.xlu1 %698 }
 0xff9   :  { %v701_v37 = vmul.f32 %v699_v35, %v678_v24  ;;  %v156_v35 = vcvt.s32.f32 %v154_v34 }
 0xffb   :  { %705 = vrot.lane.b32.xlu2 %v701_v37, %s1144_s9 }
0x1000   :  { %v713_v43 = vpop.permute.xlu1 %712 }
0x1001   :  { %v715_v44 = vsel %vm703_vm2, %v713_v43, %v623_v57 }
0x1055   :  { %v1474_v40 = vpop.permute.xlu2 %705 }
0x1056   :  { %v710_v41 = vsel %vm703_vm2, %v1474_v40, %v618_v53 }
0x1057   :  { %v720_v42 = vsel %vm181_vm8, 0.0, %v710_v41  ;;  %v719_v48 = vsel %vm181_vm8, %v710_v41, 0.0 }
0x1058   :  { %722 = vrot.lane.b32.xlu0 %v720_v42, %s1144_s9 }
0x1060   :  { %771 = vrot.lane.b32.xlu0 %v715_v44, %s1144_s9 }
0x10ca   :  { %v723_v47 = vpop.permute.xlu0 %722 }
0x10cb   :  { %v725_v49 = vsel %vm273_vm10, %v719_v48, %v723_v47  ;;  %v805_v48 = vrot.slane %v1365_v54, 6 }
0x10cc   :  { %964 = vmatmul.msk.f32.vlgmr.msra.gmra.mxu0 %vm186_vm11, %v725_v49 }
0x10cd   :  { %v809_v49 = vsel %vm149_vm3, %v805_v48, %v807_v59  ;;  %v526_v48 = vsel %vm521_vm15, %v1412_v10, -inf }
0x10d2   :  { %v772_v15 = vpop.permute.xlu0 %771 }
0x1149   :  { %v746_v33 = vpop.f32.mrf.mxu0 }
0x114a   :  { %v749_v53 = vadd.f32 %v746_v33, %v718_v51 }
0x114c   :  { %1041 = vtanh.f32 %v749_v53  ;;  %v965_v56 = vmul.f32 -1.442695, %v749_v53 }
0x114e   :  { %1043 = vpow2.f32 %v965_v56 }
0x1152   :  { %v1042_v55 = vpop.eup %1041 }
0x1153   :  { %776 = vrot.lane.b32.xlu2 %v1042_v55, %s1143_s0 }
0x1154   :  { %v1044_v57 = vpop.eup %1043 }
0x1155   :  { %v753_v58 = vadd.f32 1.0, %v1044_v57 }
0x1157   :  { %1045 = vrcp.f32 %v753_v58  ;;  %v765_v6 = vand.u32 2147483648, %v753_v58  ;;  %vm759_vm5 = vweird.f32 %v753_v58  ;;  %v763_v7 = vand.u32 2147483647, %v753_v58 }
0x1159   :  { %v766_v11 = vor.u32 1.1754944e-38, %v765_v6  ;;  %vm764_vm13 = vcmp.eq.f32.partialorder %v763_v7, 8.507059e+37 }
0x115d   :  { %v1046_v60 = vpop.eup %1045 }
0x115e   :  { %v755_v61 = vmul.f32 %v1046_v60, %v753_v58  ;;  %vm760_vm4 = vweird.f32 %v1046_v60 }
0x115f   :  { %vm761_vm12 = vmor %vm759_vm5, %vm760_vm4 }
0x1160   :  { %v756_v63 = vsub.f32 1.0, %v755_v61 }
0x1162   :  { %v757_v1 = vmul.f32 %v1046_v60, %v756_v63 }
0x1164   :  { %v758_v3 = vadd.f32 %v1046_v60, %v757_v1 }
0x1166   :  { %v762_v8 = vsel %vm761_vm12, %v1046_v60, %v758_v3 }
0x1167   :  { %v767_v13 = vsel %vm764_vm13, %v766_v11, %v762_v8 }
0x1168   :  { %v774_v16 = vmul.f32 %v772_v15, %v767_v13 }
0x11ad   :  { %v777_v12 = vpop.permute.xlu2 %776 }
0x11ae   :  { %v779_v14 = vmul.f32 %v777_v12, %v767_v13 }
0x11b0   :  { %781 = vrot.lane.b32.xlu1 %v779_v14, %s1144_s9 }
0x1222   :  { %v782_v17 = vpop.permute.xlu1 %781 }
0x1223   :  { %v784_v18 = vadd.f32 %v782_v17, %v774_v16 }
0x1225   :  { %1047 = vtanh.f32 %v784_v18 }
0x122b   :  { %v1048_v19 = vpop.eup %1047 }
0x122c   :  { %787 = vrot.lane.b32.xlu2 %v1048_v19, %s1143_s0 }
0x1234   :  { %801 = vrot.lane.b32.xlu2 %v784_v18, %s1145_s12 }
0x1286   :  { %v788_v20 = vpop.permute.xlu2 %787 }
0x1287   :  { %v790_v21 = vmul.f32 %v788_v20, %v767_v13 }
0x1289   :  { %794 = vrot.lane.b32.xlu0 %v790_v21, %s1144_s9 }
0x128e   :  { %v802_v24 = vpop.permute.xlu2 %801 }
0x128f   :  { %v804_v27 = vsel %vm792_vm14, %v802_v24, %v715_v44 }
0x1290   :  { %862 = vrot.lane.b32.xlu2 %v804_v27, %s1144_s9 }
0x12ea   :  { %v863_v53 = vpop.permute.xlu2 %862 }
0x12fb   :  { %v1509_v28 = vpop.permute.xlu0 %794 }
0x12fc   :  { %v799_v29 = vsel %vm792_vm14, %v1509_v28, %v710_v41  ;;  %v153_v41 = vand.u32 65535, %v152_v31  ;;  %v897_v31 = vld [vmem:[%s1583_s4 + $0x18] sm:$0xff]  ;;  %v797_v25 = vsel %vm792_vm14, %v1509_v28, -inf }
0x12fd   :  { %v811_v30 = vsel %vm181_vm8, 0.0, %v799_v29  ;;  %v810_v37 = vsel %vm181_vm8, %v799_v29, 0.0  ;;  %913 = vmatpush.msra.mxu2 %v897_v31 }
0x12fe   :  { %813 = vrot.lane.b32.xlu1 %v811_v30, %s1144_s9  ;;  %v155_v43 = vcvt.s32.f32 %v153_v41  ;;  %v346_v41 = vsel %vm341_vm0, %v1348_v46, -inf }
0x1328   :  { %157 = vmax.xlane.f32.xlu1 %v156_v35 }
0x1370   :  { %v814_v38 = vpop.permute.xlu1 %813 }
0x1371   :  { %v816_v42 = vsel %vm273_vm10, %v810_v37, %v814_v38  ;;  %v896_v37 = vld [vmem:[%s1583_s4 + $0x10] sm:$0xff]  ;;  %v895_v38 = vld [vmem:[%s1583_s4 + $0x8] sm:$0xff] }
0x1372   :  { %966 = vmatmul.msk.f32.vlgmr.msra.gmra.mxu1 %vm186_vm11, %v816_v42  ;;  %914 = vmatpush.msra.mxu2 %v896_v37  ;;  %v894_v42 = vld [vmem:[%s1583_s4] sm:$0xff] }
0x1374   :  { %915 = vmatpush.msra.mxu2 %v895_v38 }
0x1376   :  { %916 = vmatpush.msra.mxu2 %v894_v42 }
0x139b   :  { %v158_v44 = vpop.xlane.xlu1 %157 }
0x139c   :  { %vm159_vm4 = vcmp.eq.f32.partialorder %v156_v35, %v158_v44  ;;  %v164_v55 = vcvt.f32.s32 %v158_v44  ;;  %v435_v44 = vsel %vm430_vm6, %v1381_v26, -inf  ;;  %v882_v26 = vsel %vm181_vm8, 7, %v1141_v0 }
0x139d   :  { %v160_v47 = vsel %vm159_vm4, %v155_v43, -inf  ;;  %v254_v43 = vsel %vm249_vm9, %v1317_v5, -inf  ;;  %v708_v5 = vsel %vm703_vm2, %v1474_v40, -inf  ;;  %vm883_vm9 = vcmp.lt.s32.totalorder %v882_v26, %v1309_v2 }
0x139e   :  { %161 = vmax.xlane.f32.xlu2 %v160_v47  ;;  %v165_v56 = vshll.u32 %v164_v55, 16  ;;  %v347_v47 = vmax.f32 %v254_v43, %v346_v41  ;;  %vm927_vm8 = vcmask 123904  }
0x13a0   :  { %v436_v59 = vmax.f32 %v347_v47, %v435_v44 }
0x13a2   :  { %v527_v4 = vmax.f32 %v436_v59, %v526_v48 }
0x13a4   :  { %v617_v46 = vmax.f32 %v527_v4, %v616_v45 }
0x13a6   :  { %v709_v9 = vmax.f32 %v617_v46, %v708_v5 }
0x13a8   :  { %v798_v10 = vmax.f32 %v709_v9, %v797_v25 }
0x13ef   :  { %v837_v50 = vpop.f32.mrf.mxu1 }
0x13f0   :  { %v840_v51 = vadd.f32 %v837_v50, %v809_v49 }
0x13f2   :  { %1049 = vtanh.f32 %v840_v51  ;;  %v967_v6 = vmul.f32 -1.442695, %v840_v51 }
0x13f4   :  { %1051 = vpow2.f32 %v967_v6 }
0x13f8   :  { %v1050_v33 = vpop.eup %1049 }
0x13f9   :  { %867 = vrot.lane.b32.xlu0 %v1050_v33, %s1143_s0 }
0x13fa   :  { %v1052_v7 = vpop.eup %1051 }
0x13fb   :  { %v844_v8 = vadd.f32 1.0, %v1052_v7 }
0x13fd   :  { %1053 = vrcp.f32 %v844_v8  ;;  %v856_v16 = vand.u32 2147483648, %v844_v8  ;;  %vm850_vm13 = vweird.f32 %v844_v8  ;;  %v854_v17 = vand.u32 2147483647, %v844_v8 }
0x13ff   :  { %v857_v19 = vor.u32 1.1754944e-38, %v856_v16  ;;  %vm855_vm4 = vcmp.eq.f32.partialorder %v854_v17, 8.507059e+37 }
0x1403   :  { %v1054_v11 = vpop.eup %1053 }
0x1404   :  { %v846_v12 = vmul.f32 %v1054_v11, %v844_v8  ;;  %vm851_vm12 = vweird.f32 %v1054_v11 }
0x1405   :  { %vm852_vm1 = vmor %vm850_vm13, %vm851_vm12 }
0x1406   :  { %v847_v13 = vsub.f32 1.0, %v846_v12 }
0x1408   :  { %v848_v14 = vmul.f32 %v1054_v11, %v847_v13 }
0x140a   :  { %v849_v15 = vadd.f32 %v1054_v11, %v848_v14 }
0x140c   :  { %v853_v18 = vsel %vm852_vm1, %v1054_v11, %v849_v15 }
0x140d   :  { %v858_v21 = vsel %vm855_vm4, %v857_v19, %v853_v18 }
0x140e   :  { %v865_v24 = vmul.f32 %v863_v53, %v858_v21 }
0x1411   :  { %v162_v57 = vpop.xlane.xlu2 %161 }
0x1412   :  { %v163_v58 = vcvt.f32.s32 %v162_v57 }
0x1414   :  { %v166_v60 = vadd.s32 %v165_v56, %v163_v58 }
0x1416   :  { %v167_v61 = vrot.slane %v166_v60, 4 }
0x1418   :  { %vm168_vm11 = vcmp.gt.s32.totalorder %v166_v60, %v167_v61 }
0x1419   :  { %v169_v63 = vsel %vm168_vm11, %v166_v60, %v167_v61 }
0x141a   :  { %v170_v54 = vrot.slane %v169_v63, 2 }
0x141c   :  { %vm171_vm5 = vcmp.gt.s32.totalorder %v169_v63, %v170_v54 }
0x141d   :  { %v172_v32 = vsel %vm171_vm5, %v169_v63, %v170_v54 }
0x141e   :  { %v173_v1 = vrot.slane %v172_v32, 1 }
0x1420   :  { %vm174_vm3 = vcmp.gt.s32.totalorder %v172_v32, %v173_v1 }
0x1421   :  { %v175_v3 = vsel %vm174_vm3, %v172_v32, %v173_v1 }
0x1422   :  { %969 = vpush %v175_v3 }
0x1453   :  { %s970_s4 = spop %969 }
0x1454   :  { %p177_p0 = scmp.gt.s32.totalorder %s970_s4, 1 }
0x1456   :  { %s1586_s4 = smov (!%p177_p0, %s970_s4), 1 }
0x1457   :  { %v890_v49 = vstv %s1586_s4 }
0x1458   :  { %vm891_vm0 = vcmp.lt.s32.totalorder %v1309_v2, %v890_v49 }
0x146b   :  { %v868_v20 = vpop.permute.xlu0 %867 }
0x146c   :  { %v870_v22 = vmul.f32 %v868_v20, %v858_v21 }
0x146e   :  { %872 = vrot.lane.b32.xlu0 %v870_v22, %s1144_s9 }
0x14e0   :  { %v873_v27 = vpop.permute.xlu0 %872 }
0x14e1   :  { %v875_v29 = vadd.f32 %v873_v27, %v865_v24 }
0x14e3   :  { %1055 = vtanh.f32 %v875_v29 }
0x14e9   :  { %v1056_v30 = vpop.eup %1055 }
0x14ea   :  { %878 = vrot.lane.b32.xlu0 %v1056_v30, %s1143_s0 }
0x155c   :  { %v879_v34 = vpop.permute.xlu0 %878 }
0x155d   :  { %v881_v35 = vmul.f32 %v879_v34, %v858_v21 }
0x155f   :  { %885 = vrot.lane.b32.xlu0 %v881_v35, %s1144_s9 }
0x15d1   :  { %v886_v36 = vpop.permute.xlu0 %885 }
0x15d2   :  { %v888_v52 = vsel %vm883_vm9, %v886_v36, -inf }
0x15d3   :  { %v889_v39 = vmax.f32 %v798_v10, %v888_v52 }
0x15d5   :  { %v892_v40 = vmax.f32 %v889_v39, 0.0 }
0x15d7   :  { %v893_v50 = vsel %vm891_vm0, %v892_v40, %v889_v39 }
0x15d8   :  { %968 = vmatmul.msk.f32.vlgmr.msra.gmra.mxu2 %vm273_vm10, %v893_v50 }
0x165b   :  { %v918_v23 = vpop.f32.mrf.mxu2 }
0x165c   :  { %v922_v28 = vrot.slane %v918_v23, 2 }
0x165e   :  { %923 = vrot.lane.b32.xlu0 %v922_v28, %s1153_s20 }
0x16d0   :  { %v924_v0 = vpop.permute.xlu0 %923 }
0x16d1   :  { %v926_v62 = vadd.f32 %v924_v0, %v918_v23 }
0x16d3   :  { %928 = vst.msk [vmem:[#allocation7] sm:$0x3] %vm927_vm8, %v926_v62 }
0x16d4   :  { %939 = dma.vmem_to_hbm [thread:$0]  %s935_s22, 32, %s937_s25, [#allocation4]  }
0x16d5   :  { %1133 = dma.done.wait [#allocation4], 32  }
0x16d6   :  { %1134 = vsyncadd [#allocation4], 4294967264 }
0x16d7   :  { %944 = vsyncpa [#allocation3], 1 }
0x16d8   :  { %945 = vsyncpa [#allocation6], 1 }
0x16d9   :  { %946 = vsyncpa [#allocation4], 1 }

</bundles_post_ra>
